<compile_context>
chip_gen: v7x
topology: tpu7x:2x2x1
jax: 0.10.0
libtpu: 0.0.40
codegen_flags: <defaults>
</compile_context>

<pallas_src>
import jax
import jax.numpy as jnp
import numpy as np
from jax.experimental import pallas as pl
from jax.experimental.pallas import tpu as pltpu

K = 3
PAD = 1
BN_EPS = 1e-5
MXU_DTYPE = jnp.bfloat16       # MXU operand dtype (accumulation stays f32)
ACT_DTYPE = jnp.bfloat16       # HBM dtype of conv outputs / inter-layer activations
VMEM_LIMIT = 32 * 1024 * 1024  # raises v5e's 16 MiB scoped default, <= v6e/v7x defaults


def _round_up(x, m):
    return ((x + m - 1) // m) * m


def _pick_tile(se):
    """Spatial (sublane) tile: multiple of 8, <=512 rows, >=2 grid steps when possible."""
    return min(512, _round_up(max(pl.cdiv(se, 2), 8), 8))


# ---------------------------------------------------------------------------
# Kernel 1: conv as 9 accumulated tap matmuls + per-tile masked BN statistics
# ---------------------------------------------------------------------------
def _make_conv_stats_kernel(n_planes, taps, tile_s, cout):
    # refs = (plane_0..plane_{n-1}, w, mask, y_out, stats_out)
    #   plane_i : (Lp, Cin) f32   whole padded image (resident across spatial tiles)
    #   w       : (9, Cin, Cout) bf16
    #   mask    : (tile_s, 1) f32 validity of each extended-output position
    #   y_out   : (tile_s, Cout) bf16  raw conv output (pre-BN)
    #   stats   : (2, Cout) f32  per-tile [masked sum, masked tile-centered M2]
    def kernel(*refs):
        planes = refs[:n_planes]
        w_ref = refs[n_planes]
        mask_ref = refs[n_planes + 1]
        y_ref = refs[n_planes + 2]
        s_ref = refs[n_planes + 3]

        base = pl.program_id(1) * tile_s
        acc = jnp.zeros((tile_s, cout), jnp.float32)
        for k, (p, off) in enumerate(taps):
            patch = planes[p][pl.ds(base + off, tile_s), :].astype(MXU_DTYPE)
            acc = acc + jnp.dot(patch, w_ref[k],
                                preferred_element_type=jnp.float32)
        y_ref[...] = acc.astype(y_ref.dtype)

        m = mask_ref[...]                                        # (tile_s, 1)
        cnt = jnp.maximum(jnp.sum(m, axis=0, keepdims=True), 1.0)  # (1, 1)
        msum = jnp.sum(acc * m, axis=0, keepdims=True)           # (1, Cout)
        cen = (acc - msum / cnt) * m
        s_ref[0:1, :] = msum
        s_ref[1:2, :] = jnp.sum(cen * cen, axis=0, keepdims=True)
    return kernel


# ---------------------------------------------------------------------------
# Kernel 2: BatchNorm apply + ReLU (+ fused residual add), output aliased on y
# ---------------------------------------------------------------------------
def _bn_relu_kernel(y_ref, sc_ref, sh_ref, o_ref):
    y = y_ref[...].astype(jnp.float32)
    o_ref[...] = jnp.maximum(y * sc_ref[...] + sh_ref[...], 0.0).astype(o_ref.dtype)


def _bn_relu_add_kernel(y_ref, sc_ref, sh_ref, r_ref, o_ref):
    y = y_ref[...].astype(jnp.float32)
    o = jnp.maximum(y * sc_ref[...] + sh_ref[...], 0.0) + r_ref[...].astype(jnp.float32)
    o_ref[...] = o.astype(o_ref.dtype)


def conv_bn_relu(x, w, gamma, beta, *, stride, residual=None):
    """Conv2d(3x3, stride, pad=1, bias=False) + train-mode BatchNorm2d + ReLU.

    x: (N, H, W, Cin) NHWC; w: (Cout, Cin, 3, 3); gamma/beta: (Cout,).
    residual (optional, (N, OH, OW, Cout)) is added AFTER the ReLU inside the
    BN-apply kernel.  Returns (N, OH, OW, Cout) bf16.
    """
    N, H, W, Ci = x.shape
    Co = w.shape[0]
    OH = (H + 2 * PAD - K) // stride + 1
    OW = (W + 2 * PAD - K) // stride + 1

    # ---- wrapper-side layout prep (cheap pads/slices, NOT an im2col) --------
    xp = jnp.pad(x.astype(jnp.float32), ((0, 0), (PAD, PAD), (PAD, PAD), (0, 0)))
    if stride == 1:
        # one flattened padded image; "width-slop" conv with row pitch wq = OW+2
        wq = OW + 2
        planes2d = [xp]
        taps = [(0, kh * wq + kw) for kh in range(K) for kw in range(K)]
    else:
        # stride 2: 4 row/col parity phase planes, pitch wq = OW+1, so every tap
        # is an unstrided shifted window of exactly one plane.
        wq = OW + 1
        planes2d = []
        for ph in range(2):
            for pw in range(2):
                p = xp[:, ph::2, pw::2, :]
                p = jnp.pad(p, ((0, 0), (0, OH + 1 - p.shape[1]),
                                (0, OW + 1 - p.shape[2]), (0, 0)))
                planes2d.append(p)
        taps = [((kh % 2) * 2 + (kw % 2), (kh // 2) * wq + (kw // 2))
                for kh in range(K) for kw in range(K)]

    se = OH * wq                                  # extended (slop-padded) output length
    tile_s = _pick_tile(se)
    T = pl.cdiv(se, tile_s)
    se_pad = T * tile_s
    max_off = max(off for _, off in taps)
    lp = _round_up(se_pad + max_off + 1, 8)       # plane length incl. tap halo

    planes = []
    for p in planes2d:
        pf = p.reshape(N, p.shape[1] * p.shape[2], Ci)
        planes.append(jnp.pad(pf, ((0, 0), (0, lp - pf.shape[1]), (0, 0))))
    n_planes = len(planes)

    w_r = jnp.transpose(w, (2, 3, 1, 0)).reshape(K * K, Ci, Co).astype(MXU_DTYPE)

    # validity mask over extended output positions (excludes slop cols & tile pad)
    qs = np.arange(se_pad)
    valid = ((qs < se) & ((qs % wq) < OW)).astype(np.float32)
    mask = jnp.asarray(valid.reshape(se_pad, 1))
    cnt_t = valid.reshape(T, tile_s).sum(axis=1)               # static per-tile counts

    cparams = pltpu.CompilerParams(
        dimension_semantics=("parallel", "parallel"),
        vmem_limit_bytes=VMEM_LIMIT)
    grid = (N, T)

    plane_spec = pl.BlockSpec((None, lp, Ci), lambda n, t: (n, 0, 0))
    y_spec = pl.BlockSpec((None, tile_s, Co), lambda n, t: (n, t, 0))

    # ---- conv + per-tile BN partial statistics ------------------------------
    y, stats = pl.pallas_call(
        _make_conv_stats_kernel(n_planes, taps, tile_s, Co),
        out_shape=(jax.ShapeDtypeStruct((N, se_pad, Co), ACT_DTYPE),
                   jax.ShapeDtypeStruct((N, T, 2, Co), jnp.float32)),
        grid=grid,
        in_specs=[plane_spec] * n_planes + [
            pl.BlockSpec((K * K, Ci, Co), lambda n, t: (0, 0, 0)),
            pl.BlockSpec((tile_s, 1), lambda n, t: (t, 0)),
        ],
        out_specs=[
            y_spec,
            pl.BlockSpec((None, None, 2, Co), lambda n, t: (n, t, 0, 0)),
        ],
        compiler_params=cparams,
    )(*planes, w_r, mask)

    # ---- combine per-tile stats (Chan's parallel variance, all f32) ---------
    cnt_total = float(N * OH * OW)
    sums = stats[:, :, 0, :]                                   # (N, T, Co)
    m2s = stats[:, :, 1, :]
    mean = jnp.sum(sums, axis=(0, 1)) / cnt_total              # (Co,)
    cnt_col = jnp.asarray(cnt_t.reshape(1, T, 1))
    safe_cnt = jnp.asarray(np.maximum(cnt_t, 1.0).reshape(1, T, 1))
    m2 = (jnp.sum(m2s, axis=(0, 1))
          + jnp.sum(cnt_col * jnp.square(sums / safe_cnt - mean), axis=(0, 1)))
    var = m2 / cnt_total                                       # biased (training BN)
    inv = jax.lax.rsqrt(var + BN_EPS)
    scale = (gamma * inv).astype(jnp.float32).reshape(1, Co)
    shift = (beta - mean * gamma * inv).astype(jnp.float32).reshape(1, Co)
    # TODO(synk): BatchNorm2d running_mean/running_var buffer updates are
    # training-time state mutation and are not replicated here.

    # ---- BN apply + ReLU (+ fused residual add), aliased onto y -------------
    par_spec = pl.BlockSpec((1, Co), lambda n, t: (0, 0))
    out_shape = jax.ShapeDtypeStruct((N, se_pad, Co), ACT_DTYPE)
    if residual is None:
        out = pl.pallas_call(
            _bn_relu_kernel, out_shape=out_shape, grid=grid,
            in_specs=[y_spec, par_spec, par_spec], out_specs=y_spec,
            input_output_aliases={0: 0},
            compiler_params=cparams,
        )(y, scale, shift)
    else:
        res = residual.astype(ACT_DTYPE)
        res = jnp.pad(res, ((0, 0), (0, 0), (0, wq - OW), (0, 0))).reshape(N, se, Co)
        res = jnp.pad(res, ((0, 0), (0, se_pad - se), (0, 0)))
        out = pl.pallas_call(
            _bn_relu_add_kernel, out_shape=out_shape, grid=grid,
            in_specs=[y_spec, par_spec, par_spec, y_spec], out_specs=y_spec,
            input_output_aliases={0: 0},
            compiler_params=cparams,
        )(y, scale, shift, res)

    # drop slop columns / tile padding -> compact NHWC
    return out[:, :se, :].reshape(N, OH, wq, Co)[:, :, :OW, :]


def encoder_block(x, params):
    """LinkNet EncoderBlock forward (train-mode BatchNorm statistics). x: (N,Cin,H,W) f32."""
    xh = jnp.transpose(x, (0, 2, 3, 1))                        # NHWC internally
    w1, g1, b1 = params["conv1"]
    wd, gd, bd = params["downsample"]
    co = w1.shape[0]
    # conv1 and downsample consume identical stride-2 taps of x -> one fused conv
    y_cat = conv_bn_relu(xh,
                         jnp.concatenate([w1, wd], axis=0),
                         jnp.concatenate([g1, gd], axis=0),
                         jnp.concatenate([b1, bd], axis=0),
                         stride=2)
    t1, down = y_cat[..., :co], y_cat[..., co:]
    x2 = conv_bn_relu(t1, *params["conv2"], stride=1, residual=down)   # out1 + downsample
    t3 = conv_bn_relu(x2, *params["conv3"], stride=1)
    out = conv_bn_relu(t3, *params["conv4"], stride=1, residual=x2)    # out2 + x2
    return jnp.transpose(out, (0, 3, 1, 2)).astype(jnp.float32)


# ---------------------------------------------------------------------------
# Pure-JAX (XLA) reference with the same bf16-operand / f32-accum numerics.
# ---------------------------------------------------------------------------
def _ref_conv_block(x, w, gamma, beta, *, stride, residual=None):
    y = jax.lax.conv_general_dilated(
        x.astype(MXU_DTYPE), w.astype(MXU_DTYPE),
        window_strides=(stride, stride), padding=[(PAD, PAD), (PAD, PAD)],
        dimension_numbers=("NHWC", "OIHW", "NHWC"),
        preferred_element_type=jnp.float32)
    mean = jnp.mean(y, axis=(0, 1, 2))
    var = jnp.mean(jnp.square(y - mean), axis=(0, 1, 2))
    scale = gamma * jax.lax.rsqrt(var + BN_EPS)
    shift = beta - mean * scale
    yb = y.astype(ACT_DTYPE).astype(jnp.float32)   # mirror the kernel's bf16 store of y
    out = jnp.maximum(yb * scale + shift, 0.0)
    if residual is not None:
        out = out + residual.astype(jnp.float32)
    return out.astype(ACT_DTYPE)


def _ref_encoder(x, params):
    xh = jnp.transpose(x, (0, 2, 3, 1))
    down = _ref_conv_block(xh, *params["downsample"], stride=2)
    t1 = _ref_conv_block(xh, *params["conv1"], stride=2)
    x2 = _ref_conv_block(t1, *params["conv2"], stride=1, residual=down)
    t3 = _ref_conv_block(x2, *params["conv3"], stride=1)
    out = _ref_conv_block(t3, *params["conv4"], stride=1, residual=x2)
    return jnp.transpose(out, (0, 3, 1, 2)).astype(jnp.float32)


if __name__ == "__main__":
    key = jax.random.PRNGKey(0)
    N, Cin, Cout, H, W = 2, 4, 8, 16, 16

    def make_block_params(k, cin, cout):
        kw_, kg, kb = jax.random.split(k, 3)
        return (0.1 * jax.random.normal(kw_, (cout, cin, K, K), jnp.float32),
                1.0 + 0.1 * jax.random.normal(kg, (cout,), jnp.float32),
                0.1 * jax.random.normal(kb, (cout,), jnp.float32))

    kx, k1, k2, k3, k4, kd = jax.random.split(key, 6)
    x = jax.random.normal(kx, (N, Cin, H, W), jnp.float32)
    params = {
        "conv1": make_block_params(k1, Cin, Cout),
        "conv2": make_block_params(k2, Cout, Cout),
        "conv3": make_block_params(k3, Cout, Cout),
        "conv4": make_block_params(k4, Cout, Cout),
        "downsample": make_block_params(kd, Cin, Cout),
    }

    out = jax.block_until_ready(jax.jit(encoder_block)(x, params))
    ref = jax.block_until_ready(jax.jit(_ref_encoder)(x, params))

    assert out.shape == (N, Cout, H // 2, W // 2)
    # Both paths use bf16 conv operands / bf16 activation storage with f32
    # accumulation; tolerance covers bf16 rounding-order differences.
    np.testing.assert_allclose(np.asarray(out), np.asarray(ref),
                               rtol=2e-2, atol=2e-2)
    print("KERNEL_OK")
</pallas_src>

<mosaic_0001>
module attributes {stable_mosaic.version = 11 : i64} {
  func.func @kernel(%arg0: i32, %arg1: i32, %arg2: memref<1x96x4xf32, #tpu.memory_space<vmem>>, %arg3: memref<1x96x4xf32, #tpu.memory_space<vmem>>, %arg4: memref<1x96x4xf32, #tpu.memory_space<vmem>>, %arg5: memref<1x96x4xf32, #tpu.memory_space<vmem>>, %arg6: memref<9x4x16xbf16, #tpu.memory_space<vmem>>, %arg7: memref<40x1xf32, #tpu.memory_space<vmem>>, %arg8: memref<1x40x16xbf16, #tpu.memory_space<vmem>>, %arg9: memref<1x1x2x16xf32, #tpu.memory_space<vmem>>) attributes {dimension_semantics = [#tpu.dimension_semantics<parallel>, #tpu.dimension_semantics<parallel>], iteration_bounds = array<i64: 2, 2>, scalar_prefetch = 0 : i64, scratch_operands = 0 : i64, tpu.core_type = #tpu.core_type<tc>, window_params = [{transform_indices = @transform_0, window_bounds = array<i64: 1, 96, 4>}, {transform_indices = @transform_1, window_bounds = array<i64: 1, 96, 4>}, {transform_indices = @transform_2, window_bounds = array<i64: 1, 96, 4>}, {transform_indices = @transform_3, window_bounds = array<i64: 1, 96, 4>}, {pipeline_mode = #tpu.pipeline_mode<synchronous>, transform_indices = @transform_4, window_bounds = array<i64: 9, 4, 16>}, {transform_indices = @transform_5, window_bounds = array<i64: 40, 1>}, {transform_indices = @transform_6, window_bounds = array<i64: 1, 40, 16>}, {transform_indices = @transform_7, window_bounds = array<i64: 1, 1, 2, 16>}]} {
    %c40_i32 = arith.constant 40 : i32
    %0 = arith.muli %arg1, %c40_i32 : i32
    %cst = arith.constant 0.000000e+00 : f32
    %1 = vector.broadcast %cst : f32 to vector<40x16xf32>
    %c0_i32 = arith.constant 0 : i32
    %2 = arith.addi %0, %c0_i32 : i32
    %c0 = arith.constant 0 : index
    %3 = arith.index_cast %2 : i32 to index
    %c0_0 = arith.constant 0 : index
    %4 = vector.load %arg2[%c0, %3, %c0_0] : memref<1x96x4xf32, #tpu.memory_space<vmem>>, vector<1x40x4xf32>
    %5 = vector.shape_cast %4 : vector<1x40x4xf32> to vector<40x4xf32>
    %6 = arith.truncf %5 : vector<40x4xf32> to vector<40x4xbf16>
    %c0_1 = arith.constant 0 : index
    %c0_2 = arith.constant 0 : index
    %c0_3 = arith.constant 0 : index
    %7 = vector.load %arg6[%c0_1, %c0_2, %c0_3] : memref<9x4x16xbf16, #tpu.memory_space<vmem>>, vector<1x4x16xbf16>
    %8 = vector.shape_cast %7 : vector<1x4x16xbf16> to vector<4x16xbf16>
    %cst_4 = arith.constant dense<0.000000e+00> : vector<40x16xf32>
    %9 = tpu.matmul %6, %8, %cst_4 {dimension_numbers = #tpu.dot_dimension_numbers<[1], [0], [0], [1], [0, 0, 1, 1], [], []>} : vector<40x4xbf16>, vector<4x16xbf16>, vector<40x16xf32> -> vector<40x16xf32>
    %10 = arith.addf %1, %9 : vector<40x16xf32>
    %c0_i32_5 = arith.constant 0 : i32
    %11 = arith.addi %0, %c0_i32_5 : i32
    %c0_6 = arith.constant 0 : index
    %12 = arith.index_cast %11 : i32 to index
    %c0_7 = arith.constant 0 : index
    %13 = vector.load %arg3[%c0_6, %12, %c0_7] : memref<1x96x4xf32, #tpu.memory_space<vmem>>, vector<1x40x4xf32>
    %14 = vector.shape_cast %13 : vector<1x40x4xf32> to vector<40x4xf32>
    %15 = arith.truncf %14 : vector<40x4xf32> to vector<40x4xbf16>
    %c1 = arith.constant 1 : index
    %c0_8 = arith.constant 0 : index
    %c0_9 = arith.constant 0 : index
    %16 = vector.load %arg6[%c1, %c0_8, %c0_9] : memref<9x4x16xbf16, #tpu.memory_space<vmem>>, vector<1x4x16xbf16>
    %17 = vector.shape_cast %16 : vector<1x4x16xbf16> to vector<4x16xbf16>
    %cst_10 = arith.constant dense<0.000000e+00> : vector<40x16xf32>
    %18 = tpu.matmul %15, %17, %cst_10 {dimension_numbers = #tpu.dot_dimension_numbers<[1], [0], [0], [1], [0, 0, 1, 1], [], []>} : vector<40x4xbf16>, vector<4x16xbf16>, vector<40x16xf32> -> vector<40x16xf32>
    %19 = arith.addf %10, %18 : vector<40x16xf32>
    %c1_i32 = arith.constant 1 : i32
    %20 = arith.addi %0, %c1_i32 : i32
    %c0_11 = arith.constant 0 : index
    %21 = arith.index_cast %20 : i32 to index
    %c0_12 = arith.constant 0 : index
    %22 = vector.load %arg2[%c0_11, %21, %c0_12] : memref<1x96x4xf32, #tpu.memory_space<vmem>>, vector<1x40x4xf32>
    %23 = vector.shape_cast %22 : vector<1x40x4xf32> to vector<40x4xf32>
    %24 = arith.truncf %23 : vector<40x4xf32> to vector<40x4xbf16>
    %c2 = arith.constant 2 : index
    %c0_13 = arith.constant 0 : index
    %c0_14 = arith.constant 0 : index
    %25 = vector.load %arg6[%c2, %c0_13, %c0_14] : memref<9x4x16xbf16, #tpu.memory_space<vmem>>, vector<1x4x16xbf16>
    %26 = vector.shape_cast %25 : vector<1x4x16xbf16> to vector<4x16xbf16>
    %cst_15 = arith.constant dense<0.000000e+00> : vector<40x16xf32>
    %27 = tpu.matmul %24, %26, %cst_15 {dimension_numbers = #tpu.dot_dimension_numbers<[1], [0], [0], [1], [0, 0, 1, 1], [], []>} : vector<40x4xbf16>, vector<4x16xbf16>, vector<40x16xf32> -> vector<40x16xf32>
    %28 = arith.addf %19, %27 : vector<40x16xf32>
    %c0_i32_16 = arith.constant 0 : i32
    %29 = arith.addi %0, %c0_i32_16 : i32
    %c0_17 = arith.constant 0 : index
    %30 = arith.index_cast %29 : i32 to index
    %c0_18 = arith.constant 0 : index
    %31 = vector.load %arg4[%c0_17, %30, %c0_18] : memref<1x96x4xf32, #tpu.memory_space<vmem>>, vector<1x40x4xf32>
    %32 = vector.shape_cast %31 : vector<1x40x4xf32> to vector<40x4xf32>
    %33 = arith.truncf %32 : vector<40x4xf32> to vector<40x4xbf16>
    %c3 = arith.constant 3 : index
    %c0_19 = arith.constant 0 : index
    %c0_20 = arith.constant 0 : index
    %34 = vector.load %arg6[%c3, %c0_19, %c0_20] : memref<9x4x16xbf16, #tpu.memory_space<vmem>>, vector<1x4x16xbf16>
    %35 = vector.shape_cast %34 : vector<1x4x16xbf16> to vector<4x16xbf16>
    %cst_21 = arith.constant dense<0.000000e+00> : vector<40x16xf32>
    %36 = tpu.matmul %33, %35, %cst_21 {dimension_numbers = #tpu.dot_dimension_numbers<[1], [0], [0], [1], [0, 0, 1, 1], [], []>} : vector<40x4xbf16>, vector<4x16xbf16>, vector<40x16xf32> -> vector<40x16xf32>
    %37 = arith.addf %28, %36 : vector<40x16xf32>
    %c0_i32_22 = arith.constant 0 : i32
    %38 = arith.addi %0, %c0_i32_22 : i32
    %c0_23 = arith.constant 0 : index
    %39 = arith.index_cast %38 : i32 to index
    %c0_24 = arith.constant 0 : index
    %40 = vector.load %arg5[%c0_23, %39, %c0_24] : memref<1x96x4xf32, #tpu.memory_space<vmem>>, vector<1x40x4xf32>
    %41 = vector.shape_cast %40 : vector<1x40x4xf32> to vector<40x4xf32>
    %42 = arith.truncf %41 : vector<40x4xf32> to vector<40x4xbf16>
    %c4 = arith.constant 4 : index
    %c0_25 = arith.constant 0 : index
    %c0_26 = arith.constant 0 : index
    %43 = vector.load %arg6[%c4, %c0_25, %c0_26] : memref<9x4x16xbf16, #tpu.memory_space<vmem>>, vector<1x4x16xbf16>
    %44 = vector.shape_cast %43 : vector<1x4x16xbf16> to vector<4x16xbf16>
    %cst_27 = arith.constant dense<0.000000e+00> : vector<40x16xf32>
    %45 = tpu.matmul %42, %44, %cst_27 {dimension_numbers = #tpu.dot_dimension_numbers<[1], [0], [0], [1], [0, 0, 1, 1], [], []>} : vector<40x4xbf16>, vector<4x16xbf16>, vector<40x16xf32> -> vector<40x16xf32>
    %46 = arith.addf %37, %45 : vector<40x16xf32>
    %c1_i32_28 = arith.constant 1 : i32
    %47 = arith.addi %0, %c1_i32_28 : i32
    %c0_29 = arith.constant 0 : index
    %48 = arith.index_cast %47 : i32 to index
    %c0_30 = arith.constant 0 : index
    %49 = vector.load %arg4[%c0_29, %48, %c0_30] : memref<1x96x4xf32, #tpu.memory_space<vmem>>, vector<1x40x4xf32>
    %50 = vector.shape_cast %49 : vector<1x40x4xf32> to vector<40x4xf32>
    %51 = arith.truncf %50 : vector<40x4xf32> to vector<40x4xbf16>
    %c5 = arith.constant 5 : index
    %c0_31 = arith.constant 0 : index
    %c0_32 = arith.constant 0 : index
    %52 = vector.load %arg6[%c5, %c0_31, %c0_32] : memref<9x4x16xbf16, #tpu.memory_space<vmem>>, vector<1x4x16xbf16>
    %53 = vector.shape_cast %52 : vector<1x4x16xbf16> to vector<4x16xbf16>
    %cst_33 = arith.constant dense<0.000000e+00> : vector<40x16xf32>
    %54 = tpu.matmul %51, %53, %cst_33 {dimension_numbers = #tpu.dot_dimension_numbers<[1], [0], [0], [1], [0, 0, 1, 1], [], []>} : vector<40x4xbf16>, vector<4x16xbf16>, vector<40x16xf32> -> vector<40x16xf32>
    %55 = arith.addf %46, %54 : vector<40x16xf32>
    %c9_i32 = arith.constant 9 : i32
    %56 = arith.addi %0, %c9_i32 : i32
    %c0_34 = arith.constant 0 : index
    %57 = arith.index_cast %56 : i32 to index
    %c0_35 = arith.constant 0 : index
    %58 = vector.load %arg2[%c0_34, %57, %c0_35] : memref<1x96x4xf32, #tpu.memory_space<vmem>>, vector<1x40x4xf32>
    %59 = vector.shape_cast %58 : vector<1x40x4xf32> to vector<40x4xf32>
    %60 = arith.truncf %59 : vector<40x4xf32> to vector<40x4xbf16>
    %c6 = arith.constant 6 : index
    %c0_36 = arith.constant 0 : index
    %c0_37 = arith.constant 0 : index
    %61 = vector.load %arg6[%c6, %c0_36, %c0_37] : memref<9x4x16xbf16, #tpu.memory_space<vmem>>, vector<1x4x16xbf16>
    %62 = vector.shape_cast %61 : vector<1x4x16xbf16> to vector<4x16xbf16>
    %cst_38 = arith.constant dense<0.000000e+00> : vector<40x16xf32>
    %63 = tpu.matmul %60, %62, %cst_38 {dimension_numbers = #tpu.dot_dimension_numbers<[1], [0], [0], [1], [0, 0, 1, 1], [], []>} : vector<40x4xbf16>, vector<4x16xbf16>, vector<40x16xf32> -> vector<40x16xf32>
    %64 = arith.addf %55, %63 : vector<40x16xf32>
    %c9_i32_39 = arith.constant 9 : i32
    %65 = arith.addi %0, %c9_i32_39 : i32
    %c0_40 = arith.constant 0 : index
    %66 = arith.index_cast %65 : i32 to index
    %c0_41 = arith.constant 0 : index
    %67 = vector.load %arg3[%c0_40, %66, %c0_41] : memref<1x96x4xf32, #tpu.memory_space<vmem>>, vector<1x40x4xf32>
    %68 = vector.shape_cast %67 : vector<1x40x4xf32> to vector<40x4xf32>
    %69 = arith.truncf %68 : vector<40x4xf32> to vector<40x4xbf16>
    %c7 = arith.constant 7 : index
    %c0_42 = arith.constant 0 : index
    %c0_43 = arith.constant 0 : index
    %70 = vector.load %arg6[%c7, %c0_42, %c0_43] : memref<9x4x16xbf16, #tpu.memory_space<vmem>>, vector<1x4x16xbf16>
    %71 = vector.shape_cast %70 : vector<1x4x16xbf16> to vector<4x16xbf16>
    %cst_44 = arith.constant dense<0.000000e+00> : vector<40x16xf32>
    %72 = tpu.matmul %69, %71, %cst_44 {dimension_numbers = #tpu.dot_dimension_numbers<[1], [0], [0], [1], [0, 0, 1, 1], [], []>} : vector<40x4xbf16>, vector<4x16xbf16>, vector<40x16xf32> -> vector<40x16xf32>
    %73 = arith.addf %64, %72 : vector<40x16xf32>
    %c10_i32 = arith.constant 10 : i32
    %74 = arith.addi %0, %c10_i32 : i32
    %c0_45 = arith.constant 0 : index
    %75 = arith.index_cast %74 : i32 to index
    %c0_46 = arith.constant 0 : index
    %76 = vector.load %arg2[%c0_45, %75, %c0_46] : memref<1x96x4xf32, #tpu.memory_space<vmem>>, vector<1x40x4xf32>
    %77 = vector.shape_cast %76 : vector<1x40x4xf32> to vector<40x4xf32>
    %78 = arith.truncf %77 : vector<40x4xf32> to vector<40x4xbf16>
    %c8 = arith.constant 8 : index
    %c0_47 = arith.constant 0 : index
    %c0_48 = arith.constant 0 : index
    %79 = vector.load %arg6[%c8, %c0_47, %c0_48] : memref<9x4x16xbf16, #tpu.memory_space<vmem>>, vector<1x4x16xbf16>
    %80 = vector.shape_cast %79 : vector<1x4x16xbf16> to vector<4x16xbf16>
    %cst_49 = arith.constant dense<0.000000e+00> : vector<40x16xf32>
    %81 = tpu.matmul %78, %80, %cst_49 {dimension_numbers = #tpu.dot_dimension_numbers<[1], [0], [0], [1], [0, 0, 1, 1], [], []>} : vector<40x4xbf16>, vector<4x16xbf16>, vector<40x16xf32> -> vector<40x16xf32>
    %82 = arith.addf %73, %81 : vector<40x16xf32>
    %83 = arith.truncf %82 : vector<40x16xf32> to vector<40x16xbf16>
    %c0_50 = arith.constant 0 : index
    %c0_51 = arith.constant 0 : index
    %c0_52 = arith.constant 0 : index
    %84 = vector.load %arg8[%c0_50, %c0_51, %c0_52] : memref<1x40x16xbf16, #tpu.memory_space<vmem>>, vector<1x40x16xbf16>
    %85 = vector.shape_cast %84 : vector<1x40x16xbf16> to vector<40x16xbf16>
    %86 = vector.shape_cast %83 : vector<40x16xbf16> to vector<1x40x16xbf16>
    tpu.vector_store %arg8[%c0_50, %c0_51, %c0_52], %86 {strides = array<i32>} : memref<1x40x16xbf16, #tpu.memory_space<vmem>>, vector<1x40x16xbf16>,
    %c0_53 = arith.constant 0 : index
    %c0_54 = arith.constant 0 : index
    %87 = vector.load %arg7[%c0_53, %c0_54] : memref<40x1xf32, #tpu.memory_space<vmem>>, vector<40x1xf32>
    %cst_55 = arith.constant dense<0.000000e+00> : vector<1xf32>
    %88 = vector.multi_reduction <add>, %87, %cst_55 [0] : vector<40x1xf32> to vector<1xf32>
    %89 = vector.shape_cast %88 : vector<1xf32> to vector<1x1xf32>
    %cst_56 = arith.constant 1.000000e+00 : f32
    %90 = vector.broadcast %cst_56 : f32 to vector<1x1xf32>
    %91 = arith.maximumf %89, %90 : vector<1x1xf32>
    %92 = vector.broadcast %87 : vector<40x1xf32> to vector<40x16xf32>
    %93 = arith.mulf %82, %92 : vector<40x16xf32>
    %cst_57 = arith.constant dense<0.000000e+00> : vector<16xf32>
    %94 = vector.multi_reduction <add>, %93, %cst_57 [0] : vector<40x16xf32> to vector<16xf32>
    %95 = vector.shape_cast %94 : vector<16xf32> to vector<1x16xf32>
    %96 = vector.broadcast %91 : vector<1x1xf32> to vector<1x16xf32>
    %97 = arith.divf %95, %96 : vector<1x16xf32>
    %98 = vector.broadcast %97 : vector<1x16xf32> to vector<40x16xf32>
    %99 = arith.subf %82, %98 : vector<40x16xf32>
    %100 = vector.broadcast %87 : vector<40x1xf32> to vector<40x16xf32>
    %101 = arith.mulf %99, %100 : vector<40x16xf32>
    %c0_58 = arith.constant 0 : index
    %c0_59 = arith.constant 0 : index
    %c0_60 = arith.constant 0 : index
    %c0_61 = arith.constant 0 : index
    %102 = vector.load %arg9[%c0_58, %c0_59, %c0_60, %c0_61] : memref<1x1x2x16xf32, #tpu.memory_space<vmem>>, vector<1x1x1x16xf32>
    %103 = vector.shape_cast %102 : vector<1x1x1x16xf32> to vector<1x16xf32>
    %104 = vector.shape_cast %95 : vector<1x16xf32> to vector<1x1x1x16xf32>
    tpu.vector_store %arg9[%c0_58, %c0_59, %c0_60, %c0_61], %104 {strides = array<i32>} : memref<1x1x2x16xf32, #tpu.memory_space<vmem>>, vector<1x1x1x16xf32>,
    %105 = arith.mulf %101, %101 : vector<40x16xf32>
    %cst_62 = arith.constant dense<0.000000e+00> : vector<16xf32>
    %106 = vector.multi_reduction <add>, %105, %cst_62 [0] : vector<40x16xf32> to vector<16xf32>
    %107 = vector.shape_cast %106 : vector<16xf32> to vector<1x16xf32>
    %c0_63 = arith.constant 0 : index
    %c0_64 = arith.constant 0 : index
    %c1_65 = arith.constant 1 : index
    %c0_66 = arith.constant 0 : index
    %108 = vector.load %arg9[%c0_63, %c0_64, %c1_65, %c0_66] : memref<1x1x2x16xf32, #tpu.memory_space<vmem>>, vector<1x1x1x16xf32>
    %109 = vector.shape_cast %108 : vector<1x1x1x16xf32> to vector<1x16xf32>
    %110 = vector.shape_cast %107 : vector<1x16xf32> to vector<1x1x1x16xf32>
    tpu.vector_store %arg9[%c0_63, %c0_64, %c1_65, %c0_66], %110 {strides = array<i32>} : memref<1x1x2x16xf32, #tpu.memory_space<vmem>>, vector<1x1x1x16xf32>,
    return
  }
  func.func @transform_0(%arg0: i32, %arg1: i32) -> (i32, i32, i32) {
    %c0_i32 = arith.constant 0 : i32
    %c0_i32_0 = arith.constant 0 : i32
    %c0_i32_1 = arith.constant 0 : i32
    return %arg0, %c0_i32, %c0_i32_0 : i32, i32, i32
  }
  func.func @transform_1(%arg0: i32, %arg1: i32) -> (i32, i32, i32) {
    %c0_i32 = arith.constant 0 : i32
    %c0_i32_0 = arith.constant 0 : i32
    %c0_i32_1 = arith.constant 0 : i32
    return %arg0, %c0_i32, %c0_i32_0 : i32, i32, i32
  }
  func.func @transform_2(%arg0: i32, %arg1: i32) -> (i32, i32, i32) {
    %c0_i32 = arith.constant 0 : i32
    %c0_i32_0 = arith.constant 0 : i32
    %c0_i32_1 = arith.constant 0 : i32
    return %arg0, %c0_i32, %c0_i32_0 : i32, i32, i32
  }
  func.func @transform_3(%arg0: i32, %arg1: i32) -> (i32, i32, i32) {
    %c0_i32 = arith.constant 0 : i32
    %c0_i32_0 = arith.constant 0 : i32
    %c0_i32_1 = arith.constant 0 : i32
    return %arg0, %c0_i32, %c0_i32_0 : i32, i32, i32
  }
  func.func @transform_4(%arg0: i32, %arg1: i32) -> (i32, i32, i32) {
    %c0_i32 = arith.constant 0 : i32
    %c0_i32_0 = arith.constant 0 : i32
    %c0_i32_1 = arith.constant 0 : i32
    %c0_i32_2 = arith.constant 0 : i32
    return %c0_i32, %c0_i32_0, %c0_i32_1 : i32, i32, i32
  }
  func.func @transform_5(%arg0: i32, %arg1: i32) -> (i32, i32) {
    %c0_i32 = arith.constant 0 : i32
    %c0_i32_0 = arith.constant 0 : i32
    return %arg1, %c0_i32 : i32, i32
  }
  func.func @transform_6(%arg0: i32, %arg1: i32) -> (i32, i32, i32) {
    %c0_i32 = arith.constant 0 : i32
    %c0_i32_0 = arith.constant 0 : i32
    return %arg0, %arg1, %c0_i32 : i32, i32, i32
  }
  func.func @transform_7(%arg0: i32, %arg1: i32) -> (i32, i32, i32, i32) {
    %c0_i32 = arith.constant 0 : i32
    %c0_i32_0 = arith.constant 0 : i32
    %c0_i32_1 = arith.constant 0 : i32
    return %arg0, %arg1, %c0_i32, %c0_i32_0 : i32, i32, i32, i32
  }
}

module attributes {stable_mosaic.version = 11 : i64} {
  func.func @_bn_relu_kernel(%arg0: i32, %arg1: i32, %arg2: memref<1x40x16xbf16, #tpu.memory_space<vmem>>, %arg3: memref<1x16xf32, #tpu.memory_space<vmem>>, %arg4: memref<1x16xf32, #tpu.memory_space<vmem>>, %arg5: memref<1x40x16xbf16, #tpu.memory_space<vmem>>) attributes {dimension_semantics = [#tpu.dimension_semantics<parallel>, #tpu.dimension_semantics<parallel>], iteration_bounds = array<i64: 2, 2>, scalar_prefetch = 0 : i64, scratch_operands = 0 : i64, tpu.core_type = #tpu.core_type<tc>, window_params = [{transform_indices = @transform_0, window_bounds = array<i64: 1, 40, 16>}, {pipeline_mode = #tpu.pipeline_mode<synchronous>, transform_indices = @transform_1, window_bounds = array<i64: 1, 16>}, {pipeline_mode = #tpu.pipeline_mode<synchronous>, transform_indices = @transform_2, window_bounds = array<i64: 1, 16>}, {transform_indices = @transform_3, window_bounds = array<i64: 1, 40, 16>}]} {
    %c0 = arith.constant 0 : index
    %c0_0 = arith.constant 0 : index
    %c0_1 = arith.constant 0 : index
    %0 = vector.load %arg2[%c0, %c0_0, %c0_1] : memref<1x40x16xbf16, #tpu.memory_space<vmem>>, vector<1x40x16xbf16>
    %1 = vector.shape_cast %0 : vector<1x40x16xbf16> to vector<40x16xbf16>
    %2 = arith.extf %1 : vector<40x16xbf16> to vector<40x16xf32>
    %c0_2 = arith.constant 0 : index
    %c0_3 = arith.constant 0 : index
    %3 = vector.load %arg3[%c0_2, %c0_3] : memref<1x16xf32, #tpu.memory_space<vmem>>, vector<1x16xf32>
    %4 = vector.broadcast %3 : vector<1x16xf32> to vector<40x16xf32>
    %5 = arith.mulf %2, %4 : vector<40x16xf32>
    %c0_4 = arith.constant 0 : index
    %c0_5 = arith.constant 0 : index
    %6 = vector.load %arg4[%c0_4, %c0_5] : memref<1x16xf32, #tpu.memory_space<vmem>>, vector<1x16xf32>
    %7 = vector.broadcast %6 : vector<1x16xf32> to vector<40x16xf32>
    %8 = arith.addf %5, %7 : vector<40x16xf32>
    %cst = arith.constant 0.000000e+00 : f32
    %9 = vector.broadcast %cst : f32 to vector<40x16xf32>
    %10 = arith.maximumf %8, %9 : vector<40x16xf32>
    %11 = arith.truncf %10 : vector<40x16xf32> to vector<40x16xbf16>
    %c0_6 = arith.constant 0 : index
    %c0_7 = arith.constant 0 : index
    %c0_8 = arith.constant 0 : index
    %12 = vector.load %arg5[%c0_6, %c0_7, %c0_8] : memref<1x40x16xbf16, #tpu.memory_space<vmem>>, vector<1x40x16xbf16>
    %13 = vector.shape_cast %12 : vector<1x40x16xbf16> to vector<40x16xbf16>
    %14 = vector.shape_cast %11 : vector<40x16xbf16> to vector<1x40x16xbf16>
    tpu.vector_store %arg5[%c0_6, %c0_7, %c0_8], %14 {strides = array<i32>} : memref<1x40x16xbf16, #tpu.memory_space<vmem>>, vector<1x40x16xbf16>,
    return
  }
  func.func @transform_0(%arg0: i32, %arg1: i32) -> (i32, i32, i32) {
    %c0_i32 = arith.constant 0 : i32
    %c0_i32_0 = arith.constant 0 : i32
    return %arg0, %arg1, %c0_i32 : i32, i32, i32
  }
  func.func @transform_1(%arg0: i32, %arg1: i32) -> (i32, i32) {
    %c0_i32 = arith.constant 0 : i32
    %c0_i32_0 = arith.constant 0 : i32
    %c0_i32_1 = arith.constant 0 : i32
    return %c0_i32, %c0_i32_0 : i32, i32
  }
  func.func @transform_2(%arg0: i32, %arg1: i32) -> (i32, i32) {
    %c0_i32 = arith.constant 0 : i32
    %c0_i32_0 = arith.constant 0 : i32
    %c0_i32_1 = arith.constant 0 : i32
    return %c0_i32, %c0_i32_0 : i32, i32
  }
  func.func @transform_3(%arg0: i32, %arg1: i32) -> (i32, i32, i32) {
    %c0_i32 = arith.constant 0 : i32
    %c0_i32_0 = arith.constant 0 : i32
    return %arg0, %arg1, %c0_i32 : i32, i32, i32
  }
}

module attributes {stable_mosaic.version = 11 : i64} {
  func.func @kernel(%arg0: i32, %arg1: i32, %arg2: memref<1x104x8xf32, #tpu.memory_space<vmem>>, %arg3: memref<9x8x8xbf16, #tpu.memory_space<vmem>>, %arg4: memref<40x1xf32, #tpu.memory_space<vmem>>, %arg5: memref<1x40x8xbf16, #tpu.memory_space<vmem>>, %arg6: memref<1x1x2x8xf32, #tpu.memory_space<vmem>>) attributes {dimension_semantics = [#tpu.dimension_semantics<parallel>, #tpu.dimension_semantics<parallel>], iteration_bounds = array<i64: 2, 2>, scalar_prefetch = 0 : i64, scratch_operands = 0 : i64, tpu.core_type = #tpu.core_type<tc>, window_params = [{transform_indices = @transform_0, window_bounds = array<i64: 1, 104, 8>}, {pipeline_mode = #tpu.pipeline_mode<synchronous>, transform_indices = @transform_1, window_bounds = array<i64: 9, 8, 8>}, {transform_indices = @transform_2, window_bounds = array<i64: 40, 1>}, {transform_indices = @transform_3, window_bounds = array<i64: 1, 40, 8>}, {transform_indices = @transform_4, window_bounds = array<i64: 1, 1, 2, 8>}]} {
    %c40_i32 = arith.constant 40 : i32
    %0 = arith.muli %arg1, %c40_i32 : i32
    %cst = arith.constant 0.000000e+00 : f32
    %1 = vector.broadcast %cst : f32 to vector<40x8xf32>
    %c0_i32 = arith.constant 0 : i32
    %2 = arith.addi %0, %c0_i32 : i32
    %c0 = arith.constant 0 : index
    %3 = arith.index_cast %2 : i32 to index
    %c0_0 = arith.constant 0 : index
    %4 = vector.load %arg2[%c0, %3, %c0_0] : memref<1x104x8xf32, #tpu.memory_space<vmem>>, vector<1x40x8xf32>
    %5 = vector.shape_cast %4 : vector<1x40x8xf32> to vector<40x8xf32>
    %6 = arith.truncf %5 : vector<40x8xf32> to vector<40x8xbf16>
    %c0_1 = arith.constant 0 : index
    %c0_2 = arith.constant 0 : index
    %c0_3 = arith.constant 0 : index
    %7 = vector.load %arg3[%c0_1, %c0_2, %c0_3] : memref<9x8x8xbf16, #tpu.memory_space<vmem>>, vector<1x8x8xbf16>
    %8 = vector.shape_cast %7 : vector<1x8x8xbf16> to vector<8x8xbf16>
    %cst_4 = arith.constant dense<0.000000e+00> : vector<40x8xf32>
    %9 = tpu.matmul %6, %8, %cst_4 {dimension_numbers = #tpu.dot_dimension_numbers<[1], [0], [0], [1], [0, 0, 1, 1], [], []>} : vector<40x8xbf16>, vector<8x8xbf16>, vector<40x8xf32> -> vector<40x8xf32>
    %10 = arith.addf %1, %9 : vector<40x8xf32>
    %c1_i32 = arith.constant 1 : i32
    %11 = arith.addi %0, %c1_i32 : i32
    %c0_5 = arith.constant 0 : index
    %12 = arith.index_cast %11 : i32 to index
    %c0_6 = arith.constant 0 : index
    %13 = vector.load %arg2[%c0_5, %12, %c0_6] : memref<1x104x8xf32, #tpu.memory_space<vmem>>, vector<1x40x8xf32>
    %14 = vector.shape_cast %13 : vector<1x40x8xf32> to vector<40x8xf32>
    %15 = arith.truncf %14 : vector<40x8xf32> to vector<40x8xbf16>
    %c1 = arith.constant 1 : index
    %c0_7 = arith.constant 0 : index
    %c0_8 = arith.constant 0 : index
    %16 = vector.load %arg3[%c1, %c0_7, %c0_8] : memref<9x8x8xbf16, #tpu.memory_space<vmem>>, vector<1x8x8xbf16>
    %17 = vector.shape_cast %16 : vector<1x8x8xbf16> to vector<8x8xbf16>
    %cst_9 = arith.constant dense<0.000000e+00> : vector<40x8xf32>
    %18 = tpu.matmul %15, %17, %cst_9 {dimension_numbers = #tpu.dot_dimension_numbers<[1], [0], [0], [1], [0, 0, 1, 1], [], []>} : vector<40x8xbf16>, vector<8x8xbf16>, vector<40x8xf32> -> vector<40x8xf32>
    %19 = arith.addf %10, %18 : vector<40x8xf32>
    %c2_i32 = arith.constant 2 : i32
    %20 = arith.addi %0, %c2_i32 : i32
    %c0_10 = arith.constant 0 : index
    %21 = arith.index_cast %20 : i32 to index
    %c0_11 = arith.constant 0 : index
    %22 = vector.load %arg2[%c0_10, %21, %c0_11] : memref<1x104x8xf32, #tpu.memory_space<vmem>>, vector<1x40x8xf32>
    %23 = vector.shape_cast %22 : vector<1x40x8xf32> to vector<40x8xf32>
    %24 = arith.truncf %23 : vector<40x8xf32> to vector<40x8xbf16>
    %c2 = arith.constant 2 : index
    %c0_12 = arith.constant 0 : index
    %c0_13 = arith.constant 0 : index
    %25 = vector.load %arg3[%c2, %c0_12, %c0_13] : memref<9x8x8xbf16, #tpu.memory_space<vmem>>, vector<1x8x8xbf16>
    %26 = vector.shape_cast %25 : vector<1x8x8xbf16> to vector<8x8xbf16>
    %cst_14 = arith.constant dense<0.000000e+00> : vector<40x8xf32>
    %27 = tpu.matmul %24, %26, %cst_14 {dimension_numbers = #tpu.dot_dimension_numbers<[1], [0], [0], [1], [0, 0, 1, 1], [], []>} : vector<40x8xbf16>, vector<8x8xbf16>, vector<40x8xf32> -> vector<40x8xf32>
    %28 = arith.addf %19, %27 : vector<40x8xf32>
    %c10_i32 = arith.constant 10 : i32
    %29 = arith.addi %0, %c10_i32 : i32
    %c0_15 = arith.constant 0 : index
    %30 = arith.index_cast %29 : i32 to index
    %c0_16 = arith.constant 0 : index
    %31 = vector.load %arg2[%c0_15, %30, %c0_16] : memref<1x104x8xf32, #tpu.memory_space<vmem>>, vector<1x40x8xf32>
    %32 = vector.shape_cast %31 : vector<1x40x8xf32> to vector<40x8xf32>
    %33 = arith.truncf %32 : vector<40x8xf32> to vector<40x8xbf16>
    %c3 = arith.constant 3 : index
    %c0_17 = arith.constant 0 : index
    %c0_18 = arith.constant 0 : index
    %34 = vector.load %arg3[%c3, %c0_17, %c0_18] : memref<9x8x8xbf16, #tpu.memory_space<vmem>>, vector<1x8x8xbf16>
    %35 = vector.shape_cast %34 : vector<1x8x8xbf16> to vector<8x8xbf16>
    %cst_19 = arith.constant dense<0.000000e+00> : vector<40x8xf32>
    %36 = tpu.matmul %33, %35, %cst_19 {dimension_numbers = #tpu.dot_dimension_numbers<[1], [0], [0], [1], [0, 0, 1, 1], [], []>} : vector<40x8xbf16>, vector<8x8xbf16>, vector<40x8xf32> -> vector<40x8xf32>
    %37 = arith.addf %28, %36 : vector<40x8xf32>
    %c11_i32 = arith.constant 11 : i32
    %38 = arith.addi %0, %c11_i32 : i32
    %c0_20 = arith.constant 0 : index
    %39 = arith.index_cast %38 : i32 to index
    %c0_21 = arith.constant 0 : index
    %40 = vector.load %arg2[%c0_20, %39, %c0_21] : memref<1x104x8xf32, #tpu.memory_space<vmem>>, vector<1x40x8xf32>
    %41 = vector.shape_cast %40 : vector<1x40x8xf32> to vector<40x8xf32>
    %42 = arith.truncf %41 : vector<40x8xf32> to vector<40x8xbf16>
    %c4 = arith.constant 4 : index
    %c0_22 = arith.constant 0 : index
    %c0_23 = arith.constant 0 : index
    %43 = vector.load %arg3[%c4, %c0_22, %c0_23] : memref<9x8x8xbf16, #tpu.memory_space<vmem>>, vector<1x8x8xbf16>
    %44 = vector.shape_cast %43 : vector<1x8x8xbf16> to vector<8x8xbf16>
    %cst_24 = arith.constant dense<0.000000e+00> : vector<40x8xf32>
    %45 = tpu.matmul %42, %44, %cst_24 {dimension_numbers = #tpu.dot_dimension_numbers<[1], [0], [0], [1], [0, 0, 1, 1], [], []>} : vector<40x8xbf16>, vector<8x8xbf16>, vector<40x8xf32> -> vector<40x8xf32>
    %46 = arith.addf %37, %45 : vector<40x8xf32>
    %c12_i32 = arith.constant 12 : i32
    %47 = arith.addi %0, %c12_i32 : i32
    %c0_25 = arith.constant 0 : index
    %48 = arith.index_cast %47 : i32 to index
    %c0_26 = arith.constant 0 : index
    %49 = vector.load %arg2[%c0_25, %48, %c0_26] : memref<1x104x8xf32, #tpu.memory_space<vmem>>, vector<1x40x8xf32>
    %50 = vector.shape_cast %49 : vector<1x40x8xf32> to vector<40x8xf32>
    %51 = arith.truncf %50 : vector<40x8xf32> to vector<40x8xbf16>
    %c5 = arith.constant 5 : index
    %c0_27 = arith.constant 0 : index
    %c0_28 = arith.constant 0 : index
    %52 = vector.load %arg3[%c5, %c0_27, %c0_28] : memref<9x8x8xbf16, #tpu.memory_space<vmem>>, vector<1x8x8xbf16>
    %53 = vector.shape_cast %52 : vector<1x8x8xbf16> to vector<8x8xbf16>
    %cst_29 = arith.constant dense<0.000000e+00> : vector<40x8xf32>
    %54 = tpu.matmul %51, %53, %cst_29 {dimension_numbers = #tpu.dot_dimension_numbers<[1], [0], [0], [1], [0, 0, 1, 1], [], []>} : vector<40x8xbf16>, vector<8x8xbf16>, vector<40x8xf32> -> vector<40x8xf32>
    %55 = arith.addf %46, %54 : vector<40x8xf32>
    %c20_i32 = arith.constant 20 : i32
    %56 = arith.addi %0, %c20_i32 : i32
    %c0_30 = arith.constant 0 : index
    %57 = arith.index_cast %56 : i32 to index
    %c0_31 = arith.constant 0 : index
    %58 = vector.load %arg2[%c0_30, %57, %c0_31] : memref<1x104x8xf32, #tpu.memory_space<vmem>>, vector<1x40x8xf32>
    %59 = vector.shape_cast %58 : vector<1x40x8xf32> to vector<40x8xf32>
    %60 = arith.truncf %59 : vector<40x8xf32> to vector<40x8xbf16>
    %c6 = arith.constant 6 : index
    %c0_32 = arith.constant 0 : index
    %c0_33 = arith.constant 0 : index
    %61 = vector.load %arg3[%c6, %c0_32, %c0_33] : memref<9x8x8xbf16, #tpu.memory_space<vmem>>, vector<1x8x8xbf16>
    %62 = vector.shape_cast %61 : vector<1x8x8xbf16> to vector<8x8xbf16>
    %cst_34 = arith.constant dense<0.000000e+00> : vector<40x8xf32>
    %63 = tpu.matmul %60, %62, %cst_34 {dimension_numbers = #tpu.dot_dimension_numbers<[1], [0], [0], [1], [0, 0, 1, 1], [], []>} : vector<40x8xbf16>, vector<8x8xbf16>, vector<40x8xf32> -> vector<40x8xf32>
    %64 = arith.addf %55, %63 : vector<40x8xf32>
    %c21_i32 = arith.constant 21 : i32
    %65 = arith.addi %0, %c21_i32 : i32
    %c0_35 = arith.constant 0 : index
    %66 = arith.index_cast %65 : i32 to index
    %c0_36 = arith.constant 0 : index
    %67 = vector.load %arg2[%c0_35, %66, %c0_36] : memref<1x104x8xf32, #tpu.memory_space<vmem>>, vector<1x40x8xf32>
    %68 = vector.shape_cast %67 : vector<1x40x8xf32> to vector<40x8xf32>
    %69 = arith.truncf %68 : vector<40x8xf32> to vector<40x8xbf16>
    %c7 = arith.constant 7 : index
    %c0_37 = arith.constant 0 : index
    %c0_38 = arith.constant 0 : index
    %70 = vector.load %arg3[%c7, %c0_37, %c0_38] : memref<9x8x8xbf16, #tpu.memory_space<vmem>>, vector<1x8x8xbf16>
    %71 = vector.shape_cast %70 : vector<1x8x8xbf16> to vector<8x8xbf16>
    %cst_39 = arith.constant dense<0.000000e+00> : vector<40x8xf32>
    %72 = tpu.matmul %69, %71, %cst_39 {dimension_numbers = #tpu.dot_dimension_numbers<[1], [0], [0], [1], [0, 0, 1, 1], [], []>} : vector<40x8xbf16>, vector<8x8xbf16>, vector<40x8xf32> -> vector<40x8xf32>
    %73 = arith.addf %64, %72 : vector<40x8xf32>
    %c22_i32 = arith.constant 22 : i32
    %74 = arith.addi %0, %c22_i32 : i32
    %c0_40 = arith.constant 0 : index
    %75 = arith.index_cast %74 : i32 to index
    %c0_41 = arith.constant 0 : index
    %76 = vector.load %arg2[%c0_40, %75, %c0_41] : memref<1x104x8xf32, #tpu.memory_space<vmem>>, vector<1x40x8xf32>
    %77 = vector.shape_cast %76 : vector<1x40x8xf32> to vector<40x8xf32>
    %78 = arith.truncf %77 : vector<40x8xf32> to vector<40x8xbf16>
    %c8 = arith.constant 8 : index
    %c0_42 = arith.constant 0 : index
    %c0_43 = arith.constant 0 : index
    %79 = vector.load %arg3[%c8, %c0_42, %c0_43] : memref<9x8x8xbf16, #tpu.memory_space<vmem>>, vector<1x8x8xbf16>
    %80 = vector.shape_cast %79 : vector<1x8x8xbf16> to vector<8x8xbf16>
    %cst_44 = arith.constant dense<0.000000e+00> : vector<40x8xf32>
    %81 = tpu.matmul %78, %80, %cst_44 {dimension_numbers = #tpu.dot_dimension_numbers<[1], [0], [0], [1], [0, 0, 1, 1], [], []>} : vector<40x8xbf16>, vector<8x8xbf16>, vector<40x8xf32> -> vector<40x8xf32>
    %82 = arith.addf %73, %81 : vector<40x8xf32>
    %83 = arith.truncf %82 : vector<40x8xf32> to vector<40x8xbf16>
    %c0_45 = arith.constant 0 : index
    %c0_46 = arith.constant 0 : index
    %c0_47 = arith.constant 0 : index
    %84 = vector.load %arg5[%c0_45, %c0_46, %c0_47] : memref<1x40x8xbf16, #tpu.memory_space<vmem>>, vector<1x40x8xbf16>
    %85 = vector.shape_cast %84 : vector<1x40x8xbf16> to vector<40x8xbf16>
    %86 = vector.shape_cast %83 : vector<40x8xbf16> to vector<1x40x8xbf16>
    tpu.vector_store %arg5[%c0_45, %c0_46, %c0_47], %86 {strides = array<i32>} : memref<1x40x8xbf16, #tpu.memory_space<vmem>>, vector<1x40x8xbf16>,
    %c0_48 = arith.constant 0 : index
    %c0_49 = arith.constant 0 : index
    %87 = vector.load %arg4[%c0_48, %c0_49] : memref<40x1xf32, #tpu.memory_space<vmem>>, vector<40x1xf32>
    %cst_50 = arith.constant dense<0.000000e+00> : vector<1xf32>
    %88 = vector.multi_reduction <add>, %87, %cst_50 [0] : vector<40x1xf32> to vector<1xf32>
    %89 = vector.shape_cast %88 : vector<1xf32> to vector<1x1xf32>
    %cst_51 = arith.constant 1.000000e+00 : f32
    %90 = vector.broadcast %cst_51 : f32 to vector<1x1xf32>
    %91 = arith.maximumf %89, %90 : vector<1x1xf32>
    %92 = vector.broadcast %87 : vector<40x1xf32> to vector<40x8xf32>
    %93 = arith.mulf %82, %92 : vector<40x8xf32>
    %cst_52 = arith.constant dense<0.000000e+00> : vector<8xf32>
    %94 = vector.multi_reduction <add>, %93, %cst_52 [0] : vector<40x8xf32> to vector<8xf32>
    %95 = vector.shape_cast %94 : vector<8xf32> to vector<1x8xf32>
    %96 = vector.broadcast %91 : vector<1x1xf32> to vector<1x8xf32>
    %97 = arith.divf %95, %96 : vector<1x8xf32>
    %98 = vector.broadcast %97 : vector<1x8xf32> to vector<40x8xf32>
    %99 = arith.subf %82, %98 : vector<40x8xf32>
    %100 = vector.broadcast %87 : vector<40x1xf32> to vector<40x8xf32>
    %101 = arith.mulf %99, %100 : vector<40x8xf32>
    %c0_53 = arith.constant 0 : index
    %c0_54 = arith.constant 0 : index
    %c0_55 = arith.constant 0 : index
    %c0_56 = arith.constant 0 : index
    %102 = vector.load %arg6[%c0_53, %c0_54, %c0_55, %c0_56] : memref<1x1x2x8xf32, #tpu.memory_space<vmem>>, vector<1x1x1x8xf32>
    %103 = vector.shape_cast %102 : vector<1x1x1x8xf32> to vector<1x8xf32>
    %104 = vector.shape_cast %95 : vector<1x8xf32> to vector<1x1x1x8xf32>
    tpu.vector_store %arg6[%c0_53, %c0_54, %c0_55, %c0_56], %104 {strides = array<i32>} : memref<1x1x2x8xf32, #tpu.memory_space<vmem>>, vector<1x1x1x8xf32>,
    %105 = arith.mulf %101, %101 : vector<40x8xf32>
    %cst_57 = arith.constant dense<0.000000e+00> : vector<8xf32>
    %106 = vector.multi_reduction <add>, %105, %cst_57 [0] : vector<40x8xf32> to vector<8xf32>
    %107 = vector.shape_cast %106 : vector<8xf32> to vector<1x8xf32>
    %c0_58 = arith.constant 0 : index
    %c0_59 = arith.constant 0 : index
    %c1_60 = arith.constant 1 : index
    %c0_61 = arith.constant 0 : index
    %108 = vector.load %arg6[%c0_58, %c0_59, %c1_60, %c0_61] : memref<1x1x2x8xf32, #tpu.memory_space<vmem>>, vector<1x1x1x8xf32>
    %109 = vector.shape_cast %108 : vector<1x1x1x8xf32> to vector<1x8xf32>
    %110 = vector.shape_cast %107 : vector<1x8xf32> to vector<1x1x1x8xf32>
    tpu.vector_store %arg6[%c0_58, %c0_59, %c1_60, %c0_61], %110 {strides = array<i32>} : memref<1x1x2x8xf32, #tpu.memory_space<vmem>>, vector<1x1x1x8xf32>,
    return
  }
  func.func @transform_0(%arg0: i32, %arg1: i32) -> (i32, i32, i32) {
    %c0_i32 = arith.constant 0 : i32
    %c0_i32_0 = arith.constant 0 : i32
    %c0_i32_1 = arith.constant 0 : i32
    return %arg0, %c0_i32, %c0_i32_0 : i32, i32, i32
  }
  func.func @transform_1(%arg0: i32, %arg1: i32) -> (i32, i32, i32) {
    %c0_i32 = arith.constant 0 : i32
    %c0_i32_0 = arith.constant 0 : i32
    %c0_i32_1 = arith.constant 0 : i32
    %c0_i32_2 = arith.constant 0 : i32
    return %c0_i32, %c0_i32_0, %c0_i32_1 : i32, i32, i32
  }
  func.func @transform_2(%arg0: i32, %arg1: i32) -> (i32, i32) {
    %c0_i32 = arith.constant 0 : i32
    %c0_i32_0 = arith.constant 0 : i32
    return %arg1, %c0_i32 : i32, i32
  }
  func.func @transform_3(%arg0: i32, %arg1: i32) -> (i32, i32, i32) {
    %c0_i32 = arith.constant 0 : i32
    %c0_i32_0 = arith.constant 0 : i32
    return %arg0, %arg1, %c0_i32 : i32, i32, i32
  }
  func.func @transform_4(%arg0: i32, %arg1: i32) -> (i32, i32, i32, i32) {
    %c0_i32 = arith.constant 0 : i32
    %c0_i32_0 = arith.constant 0 : i32
    %c0_i32_1 = arith.constant 0 : i32
    return %arg0, %arg1, %c0_i32, %c0_i32_0 : i32, i32, i32, i32
  }
}

module attributes {stable_mosaic.version = 11 : i64} {
  func.func @_bn_relu_add_kernel(%arg0: i32, %arg1: i32, %arg2: memref<1x40x8xbf16, #tpu.memory_space<vmem>>, %arg3: memref<1x8xf32, #tpu.memory_space<vmem>>, %arg4: memref<1x8xf32, #tpu.memory_space<vmem>>, %arg5: memref<1x40x8xbf16, #tpu.memory_space<vmem>>, %arg6: memref<1x40x8xbf16, #tpu.memory_space<vmem>>) attributes {dimension_semantics = [#tpu.dimension_semantics<parallel>, #tpu.dimension_semantics<parallel>], iteration_bounds = array<i64: 2, 2>, scalar_prefetch = 0 : i64, scratch_operands = 0 : i64, tpu.core_type = #tpu.core_type<tc>, window_params = [{transform_indices = @transform_0, window_bounds = array<i64: 1, 40, 8>}, {pipeline_mode = #tpu.pipeline_mode<synchronous>, transform_indices = @transform_1, window_bounds = array<i64: 1, 8>}, {pipeline_mode = #tpu.pipeline_mode<synchronous>, transform_indices = @transform_2, window_bounds = array<i64: 1, 8>}, {transform_indices = @transform_3, window_bounds = array<i64: 1, 40, 8>}, {transform_indices = @transform_4, window_bounds = array<i64: 1, 40, 8>}]} {
    %c0 = arith.constant 0 : index
    %c0_0 = arith.constant 0 : index
    %c0_1 = arith.constant 0 : index
    %0 = vector.load %arg2[%c0, %c0_0, %c0_1] : memref<1x40x8xbf16, #tpu.memory_space<vmem>>, vector<1x40x8xbf16>
    %1 = vector.shape_cast %0 : vector<1x40x8xbf16> to vector<40x8xbf16>
    %2 = arith.extf %1 : vector<40x8xbf16> to vector<40x8xf32>
    %c0_2 = arith.constant 0 : index
    %c0_3 = arith.constant 0 : index
    %3 = vector.load %arg3[%c0_2, %c0_3] : memref<1x8xf32, #tpu.memory_space<vmem>>, vector<1x8xf32>
    %4 = vector.broadcast %3 : vector<1x8xf32> to vector<40x8xf32>
    %5 = arith.mulf %2, %4 : vector<40x8xf32>
    %c0_4 = arith.constant 0 : index
    %c0_5 = arith.constant 0 : index
    %6 = vector.load %arg4[%c0_4, %c0_5] : memref<1x8xf32, #tpu.memory_space<vmem>>, vector<1x8xf32>
    %7 = vector.broadcast %6 : vector<1x8xf32> to vector<40x8xf32>
    %8 = arith.addf %5, %7 : vector<40x8xf32>
    %cst = arith.constant 0.000000e+00 : f32
    %9 = vector.broadcast %cst : f32 to vector<40x8xf32>
    %10 = arith.maximumf %8, %9 : vector<40x8xf32>
    %c0_6 = arith.constant 0 : index
    %c0_7 = arith.constant 0 : index
    %c0_8 = arith.constant 0 : index
    %11 = vector.load %arg5[%c0_6, %c0_7, %c0_8] : memref<1x40x8xbf16, #tpu.memory_space<vmem>>, vector<1x40x8xbf16>
    %12 = vector.shape_cast %11 : vector<1x40x8xbf16> to vector<40x8xbf16>
    %13 = arith.extf %12 : vector<40x8xbf16> to vector<40x8xf32>
    %14 = arith.addf %10, %13 : vector<40x8xf32>
    %15 = arith.truncf %14 : vector<40x8xf32> to vector<40x8xbf16>
    %c0_9 = arith.constant 0 : index
    %c0_10 = arith.constant 0 : index
    %c0_11 = arith.constant 0 : index
    %16 = vector.load %arg6[%c0_9, %c0_10, %c0_11] : memref<1x40x8xbf16, #tpu.memory_space<vmem>>, vector<1x40x8xbf16>
    %17 = vector.shape_cast %16 : vector<1x40x8xbf16> to vector<40x8xbf16>
    %18 = vector.shape_cast %15 : vector<40x8xbf16> to vector<1x40x8xbf16>
    tpu.vector_store %arg6[%c0_9, %c0_10, %c0_11], %18 {strides = array<i32>} : memref<1x40x8xbf16, #tpu.memory_space<vmem>>, vector<1x40x8xbf16>,
    return
  }
  func.func @transform_0(%arg0: i32, %arg1: i32) -> (i32, i32, i32) {
    %c0_i32 = arith.constant 0 : i32
    %c0_i32_0 = arith.constant 0 : i32
    return %arg0, %arg1, %c0_i32 : i32, i32, i32
  }
  func.func @transform_1(%arg0: i32, %arg1: i32) -> (i32, i32) {
    %c0_i32 = arith.constant 0 : i32
    %c0_i32_0 = arith.constant 0 : i32
    %c0_i32_1 = arith.constant 0 : i32
    return %c0_i32, %c0_i32_0 : i32, i32
  }
  func.func @transform_2(%arg0: i32, %arg1: i32) -> (i32, i32) {
    %c0_i32 = arith.constant 0 : i32
    %c0_i32_0 = arith.constant 0 : i32
    %c0_i32_1 = arith.constant 0 : i32
    return %c0_i32, %c0_i32_0 : i32, i32
  }
  func.func @transform_3(%arg0: i32, %arg1: i32) -> (i32, i32, i32) {
    %c0_i32 = arith.constant 0 : i32
    %c0_i32_0 = arith.constant 0 : i32
    return %arg0, %arg1, %c0_i32 : i32, i32, i32
  }
  func.func @transform_4(%arg0: i32, %arg1: i32) -> (i32, i32, i32) {
    %c0_i32 = arith.constant 0 : i32
    %c0_i32_0 = arith.constant 0 : i32
    return %arg0, %arg1, %c0_i32 : i32, i32, i32
  }
}

module attributes {stable_mosaic.version = 11 : i64} {
  func.func @_bn_relu_kernel(%arg0: i32, %arg1: i32, %arg2: memref<1x40x8xbf16, #tpu.memory_space<vmem>>, %arg3: memref<1x8xf32, #tpu.memory_space<vmem>>, %arg4: memref<1x8xf32, #tpu.memory_space<vmem>>, %arg5: memref<1x40x8xbf16, #tpu.memory_space<vmem>>) attributes {dimension_semantics = [#tpu.dimension_semantics<parallel>, #tpu.dimension_semantics<parallel>], iteration_bounds = array<i64: 2, 2>, scalar_prefetch = 0 : i64, scratch_operands = 0 : i64, tpu.core_type = #tpu.core_type<tc>, window_params = [{transform_indices = @transform_0, window_bounds = array<i64: 1, 40, 8>}, {pipeline_mode = #tpu.pipeline_mode<synchronous>, transform_indices = @transform_1, window_bounds = array<i64: 1, 8>}, {pipeline_mode = #tpu.pipeline_mode<synchronous>, transform_indices = @transform_2, window_bounds = array<i64: 1, 8>}, {transform_indices = @transform_3, window_bounds = array<i64: 1, 40, 8>}]} {
    %c0 = arith.constant 0 : index
    %c0_0 = arith.constant 0 : index
    %c0_1 = arith.constant 0 : index
    %0 = vector.load %arg2[%c0, %c0_0, %c0_1] : memref<1x40x8xbf16, #tpu.memory_space<vmem>>, vector<1x40x8xbf16>
    %1 = vector.shape_cast %0 : vector<1x40x8xbf16> to vector<40x8xbf16>
    %2 = arith.extf %1 : vector<40x8xbf16> to vector<40x8xf32>
    %c0_2 = arith.constant 0 : index
    %c0_3 = arith.constant 0 : index
    %3 = vector.load %arg3[%c0_2, %c0_3] : memref<1x8xf32, #tpu.memory_space<vmem>>, vector<1x8xf32>
    %4 = vector.broadcast %3 : vector<1x8xf32> to vector<40x8xf32>
    %5 = arith.mulf %2, %4 : vector<40x8xf32>
    %c0_4 = arith.constant 0 : index
    %c0_5 = arith.constant 0 : index
    %6 = vector.load %arg4[%c0_4, %c0_5] : memref<1x8xf32, #tpu.memory_space<vmem>>, vector<1x8xf32>
    %7 = vector.broadcast %6 : vector<1x8xf32> to vector<40x8xf32>
    %8 = arith.addf %5, %7 : vector<40x8xf32>
    %cst = arith.constant 0.000000e+00 : f32
    %9 = vector.broadcast %cst : f32 to vector<40x8xf32>
    %10 = arith.maximumf %8, %9 : vector<40x8xf32>
    %11 = arith.truncf %10 : vector<40x8xf32> to vector<40x8xbf16>
    %c0_6 = arith.constant 0 : index
    %c0_7 = arith.constant 0 : index
    %c0_8 = arith.constant 0 : index
    %12 = vector.load %arg5[%c0_6, %c0_7, %c0_8] : memref<1x40x8xbf16, #tpu.memory_space<vmem>>, vector<1x40x8xbf16>
    %13 = vector.shape_cast %12 : vector<1x40x8xbf16> to vector<40x8xbf16>
    %14 = vector.shape_cast %11 : vector<40x8xbf16> to vector<1x40x8xbf16>
    tpu.vector_store %arg5[%c0_6, %c0_7, %c0_8], %14 {strides = array<i32>} : memref<1x40x8xbf16, #tpu.memory_space<vmem>>, vector<1x40x8xbf16>,
    return
  }
  func.func @transform_0(%arg0: i32, %arg1: i32) -> (i32, i32, i32) {
    %c0_i32 = arith.constant 0 : i32
    %c0_i32_0 = arith.constant 0 : i32
    return %arg0, %arg1, %c0_i32 : i32, i32, i32
  }
  func.func @transform_1(%arg0: i32, %arg1: i32) -> (i32, i32) {
    %c0_i32 = arith.constant 0 : i32
    %c0_i32_0 = arith.constant 0 : i32
    %c0_i32_1 = arith.constant 0 : i32
    return %c0_i32, %c0_i32_0 : i32, i32
  }
  func.func @transform_2(%arg0: i32, %arg1: i32) -> (i32, i32) {
    %c0_i32 = arith.constant 0 : i32
    %c0_i32_0 = arith.constant 0 : i32
    %c0_i32_1 = arith.constant 0 : i32
    return %c0_i32, %c0_i32_0 : i32, i32
  }
  func.func @transform_3(%arg0: i32, %arg1: i32) -> (i32, i32, i32) {
    %c0_i32 = arith.constant 0 : i32
    %c0_i32_0 = arith.constant 0 : i32
    return %arg0, %arg1, %c0_i32 : i32, i32, i32
  }
}

</mosaic_0001>

<bundles_post_ra>
// kernel: encoder_block.9
= control target key start
LH: loop header
LB: loop body
LE: loop exit
PB: predicated region body
PF: predicated region fallthrough
CT: control target
= control target key end

     0   :  { %s497_s12 = smov 0   ;;  %s499_s13 = smov 0   ;;  %s554_s0 = inlined_call_operand.vmem [shape: bf16[2,80,16], index: 0, kind: input, shape index: {}, may-alias: {0,3}]   ;;  %s555_s1 = inlined_call_operand.vmem [shape: f32[1,16], index: 1, kind: input, shape index: {}]   ;;  %s556_s2 = inlined_call_operand.vmem [shape: f32[1,16], index: 2, kind: input, shape index: {}]   ;;  %s557_s3 = inlined_call_operand.vmem [shape: bf16[2,80,16], index: 3, kind: output, shape index: {}, may-alias: {0,3}]  }
   0x1   :  { %s501_s14 = smov 0   ;;  %s503_s15 = smov 0  }
   0x2   :  { %s505_s16 = smov 0  }
   0x3 LB: > { %s22_s17 = sadd.s32 1, %s467_s14  ;;  %s25_s18 = sadd.s32 1, %s471_s15  ;;  %s475_s16 = sphi %s505_s16, %s13_s16   ;;  %s471_s15 = sphi %s503_s15, %s561_s15   ;;  %s467_s14 = sphi %s501_s14, %s560_s14   ;;  %s463_s13 = sphi %s499_s13, %s559_s13   ;;  %s459_s12 = sphi %s497_s12, %s558_s12  }
   0x4   : > { %p23_p0 = scmp.ge.s32.totalorder %s22_s17, 2  ;;  %p370_p1 = scmp.ge.s32.totalorder %s475_s16, 1 }
   0x5   : > { %p158_p2 = scmp.lt.s32.totalorder %s475_s16, 5 }
   0x6   : > { %s563_s17 = smov (%p23_p0, %s22_s17), 0  ;;  %s565_s18 = smov (!%p23_p0, %s25_s18), %s471_s15 }
   0x7   : > { %p159_p3 = pnand %p370_p1, %p158_p2  ;;  %p27_p4 = scmp.ge.s32.totalorder %s565_s18, 2 }
   0x8   : > { %s190_s19 = smul.u32 (!%p159_p3), 5, %s459_s12  ;;  %p191_p5 = scmp.lt.s32.totalorder (!%p159_p3), %s463_s13, 1  ;;  %v373_v0 = vld [vmem:[%s555_s1] ss:$0 sm:$0xff] (!%p159_p3)  ;;  %vm270_vm0 = vcmask (!%p159_p3), 125952  }
   0x9   : > { %s567_s18 = smov (%p27_p4, %s565_s18), 0  ;;  %162 = sbr.rel (%p159_p3) target bundleno = 36 (0x24), region = 32 }
   0xa   : > { %p193_p6 = scmp.lt.s32.totalorder (!%p159_p3), %s190_s19, 9  ;;  %v374_v8 = vld [vmem:[%s556_s2] ss:$0 sm:$0xff] (!%p159_p3) }
  0x10   : > { %s569_s13 = smov (!%p191_p5, %s463_s13), 1  ;;  %s571_s19 = smov (!%p193_p6, %s190_s19), 9 }
  0x11   : > { %s396_s20 = smul.u32 10, %s569_s13 }
  0x13   : > { %s196_s21 = sadd.s32 %s396_s20, %s571_s19 }
  0x14   : > { %s371_s22 = sshll.u32 %s196_s21, 2 }
  0x15   : > { %s198_s25 = scalar_lea.vmem %s554_s0, %s371_s22  ;;  %s208_s5 = scalar_lea.vmem %s557_s3, %s371_s22 }
  0x16   : > { %v388_v1 = vld [vmem:[%s198_s25] sm:$0xff]   ;;  %v395_v2 = vld [vmem:[%s198_s25 + $0x8] sm:$0xff]   ;;  %v214_v3 = vld [vmem:[%s198_s25 + $0x10] sm:$0xf] }
  0x17   : > { %v389_v4 = vunpack.c.l.bf16 %v388_v1  ;;  %v219_v5 = vunpack.c.l.bf16 %v214_v3  ;;  %v390_v6 = vunpack.c.h.bf16 %v388_v1  ;;  %v393_v7 = vunpack.c.l.bf16 %v395_v2 }
  0x18   : > { %v394_v9 = vunpack.c.h.bf16 %v395_v2 }
  0x19   : > { %v227_v10 = vmul.f32 %v389_v4, %v373_v0  ;;  %v231_v11 = vmul.f32 %v373_v0, %v219_v5  ;;  %v228_v12 = vmul.f32 %v390_v6, %v373_v0  ;;  %v229_v13 = vmul.f32 %v393_v7, %v373_v0 }
  0x1a   : > { %v230_v14 = vmul.f32 %v394_v9, %v373_v0 }
  0x1b   : > { %v239_v15 = vadd.f32 %v374_v8, %v227_v10  ;;  %v240_v16 = vadd.f32 %v374_v8, %v228_v12  ;;  %v241_v17 = vadd.f32 %v374_v8, %v229_v13  ;;  %v243_v18 = vadd.f32 %v374_v8, %v231_v11 }
  0x1c   : > { %v242_v19 = vadd.f32 %v374_v8, %v230_v14 }
  0x1d   : > { %v244_v20 = vmax.f32 %v239_v15, 0.0  ;;  %v245_v21 = vmax.f32 %v240_v16, 0.0  ;;  %v246_v22 = vmax.f32 %v241_v17, 0.0  ;;  %v248_v23 = vmax.f32 %v243_v18, 0.0 }
  0x1e   : > { %v247_v24 = vmax.f32 %v242_v19, 0.0 }
  0x1f   : > { %v382_v25 = vpack.c.bf16 %v244_v20, %v244_v20  ;;  %v383_v26 = vpack.c.bf16 %v245_v21, %v245_v21  ;;  %v384_v27 = vpack.c.bf16 %v246_v22, %v246_v22  ;;  %v386_v28 = vpack.c.bf16 %v248_v23, %v248_v23 }
  0x20   : > { %v385_v29 = vpack.c.bf16 %v247_v24, %v247_v24 }
  0x21   : > { %271 = vst.msk [vmem:[%s208_s5] sm:$0xf] %vm270_vm0, %v382_v25  ;;  %272 = vst.msk [vmem:[%s208_s5 + $0x4] sm:$0xf] %vm270_vm0, %v383_v26 }
  0x22   : > { %273 = vst.msk [vmem:[%s208_s5 + $0x8] sm:$0xf] %vm270_vm0, %v384_v27  ;;  %275 = vst.msk [vmem:[%s208_s5 + $0x10] sm:$0xf] %vm270_vm0, %v386_v28 }
  0x23   : > { %274 = vst.msk [vmem:[%s208_s5 + $0xc] sm:$0xf] %vm270_vm0, %v385_v29 }
  0x24 PF: > { %s13_s16 = sadd.s32 1, %s475_s16   ;;  %s558_s12 = smov %s467_s14 }
  0x25   : > { %p10_p7 = scmp.ge.s32.totalorder %s13_s16, 6   ;;  %s559_s13 = smov %s471_s15 }
  0x26   : > { %s560_s14 = smov %s563_s17  ;;  %s561_s15 = smov %s567_s18 }
  0x27   :  { %12 = sbr.rel (!%p10_p7) target bundleno = 3 (0x3), region = 62 }

// kernel: encoder_block.8
= control target key start
LH: loop header
LB: loop body
LE: loop exit
PB: predicated region body
PF: predicated region fallthrough
CT: control target
= control target key end

     0   :  { %s1964_s24 = smov 0   ;;  %s1966_s25 = smov 0   ;;  %s2290_s0 = inlined_call_operand.vmem [shape: f32[2,96,4], index: 0, kind: input, shape index: {}]   ;;  %s2291_s1 = inlined_call_operand.vmem [shape: f32[2,96,4], index: 1, kind: input, shape index: {}]   ;;  %s2292_s2 = inlined_call_operand.vmem [shape: f32[2,96,4], index: 2, kind: input, shape index: {}]   ;;  %s2293_s3 = inlined_call_operand.vmem [shape: f32[2,96,4], index: 3, kind: input, shape index: {}]   ;;  %s2294_s4 = inlined_call_operand.vmem [shape: bf16[9,4,16], index: 4, kind: input, shape index: {}]   ;;  %s2295_s5 = inlined_call_operand.vmem [shape: f32[80,1], index: 5, kind: input, shape index: {}]   ;;  %s2296_s6 = inlined_call_operand.vmem [shape: bf16[2,80,16], index: 6, kind: output, shape index: {0}]   ;;  %s2297_s7 = inlined_call_operand.vmem [shape: f32[2,2,2,16], index: 7, kind: output, shape index: {1}]  }
   0x1   :  { %s1968_s26 = smov 0   ;;  %s1970_s27 = smov 0  }
   0x2   :  { %s1972_s28 = smov 0  }
   0x3 LB: > { %s27_s29 = sadd.s32 1, %s1911_s26  ;;  %s30_s30 = sadd.s32 1, %s1915_s27  ;;  %s1919_s28 = sphi %s1972_s28, %s18_s28   ;;  %s1915_s27 = sphi %s1970_s27, %s2301_s27   ;;  %s1911_s26 = sphi %s1968_s26, %s2300_s26   ;;  %s1907_s25 = sphi %s1966_s25, %s2299_s25   ;;  %s1903_s24 = sphi %s1964_s24, %s2298_s24  }
   0x4   : > { %p28_p0 = scmp.ge.s32.totalorder %s27_s29, 2  ;;  %p1498_p1 = scmp.ge.s32.totalorder %s1919_s28, 1 }
   0x5   : > { %p297_p2 = scmp.lt.s32.totalorder %s1919_s28, 5 }
   0x6   : > { %s2303_s29 = smov (%p28_p0, %s27_s29), 0  ;;  %s2305_s30 = smov (!%p28_p0, %s30_s30), %s1915_s27 }
   0x7   : > { %p298_p3 = pnand %p1498_p1, %p297_p2  ;;  %p32_p4 = scmp.ge.s32.totalorder %s2305_s30, 2 }
   0x8   : > { %v1507_v0 = vld [vmem:[%s2294_s4 + $0x2] sm:$0x3] (!%p298_p3)  ;;  %vm438_vm0 = vcmask (!%p298_p3), 1041408   ;;  %v1527_v1 = vld [vmem:[%s2294_s4 + $0x8] sm:$0x3] (!%p298_p3)  ;;  %v1921_v2 = vmov (!%p298_p3), 0.0  }
   0x9   : > { %s2307_s30 = smov (%p32_p4, %s2305_s30), 0  ;;  %301 = sbr.rel (%p298_p3) target bundleno = 389 (0x185), region = 44 }
   0xa   : > { %1615 = vmatprep.subr.bf16.mxu1 (!%p298_p3), %v1921_v2  ;;  %v440_v3 = vsel (!%p298_p3), %vm438_vm0, %v1507_v0, 0  ;;  %1671 = vmatprep.subr.bf16.mxu0 (!%p298_p3), %v1921_v2  ;;  %v2006_v4 = vsel (!%p298_p3), %vm438_vm0, %v1527_v1, 0  ;;  %p361_p5 = scmp.lt.s32.totalorder (!%p298_p3), %s1907_s25, 1  ;;  %vm1922_vm1 = vmmov (!%p298_p3), 0   ;;  %s2017_s12 = smul.u32 (!%p298_p3), 40, %s1903_s24  ;;  %v1923_v5 = vmov (!%p298_p3), 0  }
   0xb   : > { %1616 = vmatpush3.bf16.msra.mxu1 (!%p298_p3), %v440_v3  ;;  %1672 = vmatpush3.bf16.msra.mxu0 (!%p298_p3), %v2006_v4  ;;  %v416_v6 = vld [vmem:[%s2294_s4] sm:$0x3] (!%p298_p3)  ;;  %s381_s19 = smul.u32 (!%p298_p3), 5, %s1903_s24  ;;  %vm428_vm2 = vcmask (!%p298_p3), 31744   ;;  %v1536_v9 = vld [vmem:[%s2294_s4 + $0xa] sm:$0x3] (!%p298_p3) }
   0xc   : > { %1617 = vmatprep.mubr.msk.bf16.mxu1 (!%p298_p3), %vm1922_vm1, %v1921_v2  ;;  %1629 = vmatprep.subr.bf16.mxu1 (!%p298_p3), %v1921_v2  ;;  %v508_v11 = vsel (!%p298_p3), %vm438_vm0, %v416_v6, 0  ;;  %v840_v15 = vsel (!%p298_p3), %vm438_vm0, %v1536_v9, 0  ;;  %vm1189_vm3 = vcmask (!%p298_p3), 7168   ;;  %v1545_v22 = vld [vmem:[%s2294_s4 + $0xc] sm:$0x3] (!%p298_p3)  ;;  %vm1178_vm4 = vcmask (!%p298_p3), 125952  }
   0xd   : > { %1673 = vmatprep.mubr.msk.bf16.mxu0 (!%p298_p3), %vm1922_vm1, %v1921_v2  ;;  %1685 = vmatprep.subr.bf16.mxu0 (!%p298_p3), %v1921_v2  ;;  %p382_p6 = scmp.lt.s32.totalorder (!%p298_p3), %s381_s19, 9  ;;  %v925_v30 = vsel (!%p298_p3), %vm438_vm0, %v1545_v22, 0  ;;  %v1519_v44 = vld [vmem:[%s2294_s4 + $0x4] sm:$0x3] (!%p298_p3)  ;;  %v1554_v62 = vld [vmem:[%s2294_s4 + $0xe] sm:$0x3] (!%p298_p3) }
   0xe   : > { %1877 = vset.pattern.permute.xlu0 (!%p298_p3), %v1923_v5  ;;  %1878 = vset.pattern.permute.xlu1 (!%p298_p3), %v1923_v5  ;;  %v588_v48 = vsel (!%p298_p3), %vm438_vm0, %v1519_v44, 0  ;;  %v1009_v3 = vsel (!%p298_p3), %vm438_vm0, %v1554_v62, 0  ;;  %v1523_v9 = vld [vmem:[%s2294_s4 + $0x6] sm:$0x3] (!%p298_p3)  ;;  %vm1236_vm5 = vcmask (!%p298_p3), 130048   ;;  %p399_p7 = scmp.lt.s32.totalorder (!%p298_p3), %s1903_s24, 1 }
   0xf   : > { %vm1269_vm6 = vcmask (!%p298_p3), 122880  }
  0x10   : > { %s2309_s25 = smov (!%p361_p5, %s1907_s25), 1  ;;  %s2311_s19 = smov (!%p382_p6, %s381_s19), 9 }
  0x11   : > { %s2021_s13 = smul.u32 96, %s2309_s25  ;;  %s1503_s17 = sshll.u32 %s2311_s19, 3 }
  0x12   : > { %s385_s22 = scalar_lea.vmem %s2295_s5, %s1503_s17  ;;  %s2313_s24 = smov (!%p399_p7, %s1903_s24), 1 }
  0x13   : > { %s370_s16 = scalar_lea.vmem %s2291_s1, %s2021_s13  ;;  %s380_s23 = scalar_lea.vmem %s2293_s3, %s2021_s13  ;;  %v1184_v24 = vld [vmem:[%s385_s22] sm:$0xff]  ;;  %v1185_v26 = vld [vmem:[%s385_s22 + $0x8] sm:$0xff]  ;;  %v1186_v27 = vld [vmem:[%s385_s22 + $0x10] sm:$0xff] }
  0x14   : > { %s2032_s20 = scalar_lea.vmem %s370_s16, %s2017_s12  ;;  %s2045_s10 = scalar_lea.vmem %s380_s23, %s2017_s12  ;;  %1208 = vperm.xlu0 %1877, %v1184_v24   ;;  %v1190_v25 = vsel %vm1189_vm3, %v1184_v24, 0.0  ;;  %v1187_v28 = vld [vmem:[%s385_s22 + $0x18] sm:$0xff]  ;;  %v1191_v31 = vsel %vm1189_vm3, %v1185_v26, 0.0  ;;  %1218 = vperm.xlu1 %1878, %v1186_v27   ;;  %v1193_v32 = vsel %vm1189_vm3, %v1186_v27, 0.0  ;;  %v1188_v34 = vld [vmem:[%s385_s22 + $0x20] sm:$0xff] }
  0x15   : > { %v418_v7 = vld [vmem:[%s2032_s20] sm:$0xff]  ;;  %v419_v8 = vld [vmem:[%s2032_s20 + $0x8] sm:$0xff]  ;;  %s375_s15 = scalar_lea.vmem %s2292_s2, %s2021_s13  ;;  %v420_v16 = vld [vmem:[%s2032_s20 + $0x10] sm:$0xff]  ;;  %s365_s14 = scalar_lea.vmem %s2290_s0, %s2021_s13  ;;  %v1192_v33 = vadd.f32 %v1191_v31, %v1190_v25  ;;  %v1195_v35 = vsel %vm1189_vm3, %v1187_v28, 0.0  ;;  %v1197_v39 = vsel %vm1189_vm3, %v1188_v34, 0.0 }
  0x16   : > { %v423_v10 = vpack.c.bf16 %v419_v8, %v418_v7  ;;  %v736_v12 = vld [vmem:[%s2045_s10] sm:$0xff]  ;;  %v737_v13 = vld [vmem:[%s2045_s10 + $0x8] sm:$0xff]  ;;  %v421_v17 = vld [vmem:[%s2032_s20 + $0x18] sm:$0xff]  ;;  %s2066_s16 = scalar_lea.vmem %s375_s15, %s2017_s12  ;;  %s2091_s15 = scalar_lea.vmem %s365_s14, %s2017_s12 }
  0x17   : > { %v741_v14 = vpack.c.bf16 %v737_v13, %v736_v12  ;;  %v424_v18 = vpack.c.bf16 %v421_v17, %v420_v16  ;;  %v1531_v19 = vld [vmem:[%s2066_s16 + $0x1] sm:$0xff]  ;;  %v1532_v20 = vld [vmem:[%s2066_s16 + $0x9] sm:$0xff]  ;;  %v1533_v36 = vld [vmem:[%s2066_s16 + $0x11] sm:$0xff]  ;;  %v1194_v38 = vadd.f32 %v1193_v32, %v1192_v33 }
  0x18   : > { %1618 = vmatmul.mubr.msk.bf16.vlgmr.msra.gmra.mrb[0].mxu1 %vm428_vm2, %v423_v10  ;;  %v422_v21 = vld [vmem:[%s2032_s20 + $0x20] sm:$0xff]  ;;  %v825_v23 = vpack.c.bf16 %v1532_v20, %v1531_v19  ;;  %v409_v41 = vld [vmem:[%s2091_s15 + $0x8] sm:$0xff]  ;;  %1213 = vperm.xlu0 %1877, %v1185_v26   ;;  %v410_v51 = vld [vmem:[%s2091_s15 + $0x10] sm:$0xff] }
  0x19   : > { %1630 = vmatpush3.bf16.msra.mxu1 %v508_v11  ;;  %1621 = vmatprep.mubr.msk.bf16.mxu1 %vm1922_vm1, %v1921_v2  ;;  %v425_v29 = vpack.c.bf16 %v422_v21, %v422_v21  ;;  %v1534_v37 = vld [vmem:[%s2066_s16 + $0x19] sm:$0xff]  ;;  %v1196_v42 = vadd.f32 %v1195_v35, %v1194_v38  ;;  %v1535_v49 = vld [vmem:[%s2066_s16 + $0x21] sm:$0xff]  ;;  %v1540_v58 = vld [vmem:[%s2091_s15 + $0x9] sm:$0xff]  ;;  %v672_v11 = vsel %vm438_vm0, %v1523_v9, 0 }
  0x1a   : > { %1674 = vmatmul.mubr.msk.bf16.vlgmr.msra.gmra.mrb[0].mxu0 %vm428_vm2, %v741_v14  ;;  %1643 = vmatprep.subr.bf16.mxu1 %v1921_v2  ;;  %v408_v40 = vld [vmem:[%s2091_s15] sm:$0xff]  ;;  %v826_v43 = vpack.c.bf16 %v1534_v37, %v1533_v36  ;;  %v411_v52 = vld [vmem:[%s2091_s15 + $0x18] sm:$0xff]  ;;  %v827_v54 = vpack.c.bf16 %v1535_v49, %v1535_v49  ;;  %v1544_v12 = vld [vmem:[%s2091_s15 + $0x29] sm:$0xff] }
  0x1b   : > { %1686 = vmatpush3.bf16.msra.mxu0 %v840_v15  ;;  %1687 = vmatprep.mubr.msk.bf16.mxu0 %vm1922_vm1, %v1921_v2  ;;  %v1198_v45 = vadd.f32 %v1197_v39, %v1196_v42  ;;  %v413_v46 = vpack.c.bf16 %v409_v41, %v408_v40  ;;  %v414_v56 = vpack.c.bf16 %v411_v52, %v410_v51  ;;  %v1541_v59 = vld [vmem:[%s2091_s15 + $0x11] sm:$0xff]  ;;  %v412_v61 = vld [vmem:[%s2091_s15 + $0x20] sm:$0xff]  ;;  %v1549_v15 = vld [vmem:[%s2032_s20 + $0x9] sm:$0xff] }
  0x1c   : > { %1699 = vmatprep.subr.bf16.mxu0 %v1921_v2  ;;  %1223 = vperm.xlu1 %1878, %v1187_v28   ;;  %v910_v0 = vpack.c.bf16 %v1541_v59, %v1540_v58  ;;  %v415_v1 = vpack.c.bf16 %v412_v61, %v412_v61  ;;  %v1542_v5 = vld [vmem:[%s2091_s15 + $0x19] sm:$0xff]  ;;  %v1543_v6 = vld [vmem:[%s2091_s15 + $0x21] sm:$0xff]  ;;  %v912_v13 = vpack.c.bf16 %v1544_v12, %v1544_v12  ;;  %v1550_v16 = vld [vmem:[%s2032_s20 + $0x11] sm:$0xff] }
  0x1d   : > { %1228 = vperm.xlu0 %1877, %v1188_v34   ;;  %v1199_v47 = vrot.slane %v1198_v45, 4  ;;  %v1514_v7 = vld [vmem:[%s2091_s15 + $0x1] sm:$0xff]  ;;  %v911_v8 = vpack.c.bf16 %v1543_v6, %v1542_v5  ;;  %v574_v14 = vpack.c.bf16 %v1542_v5, %v1541_v59  ;;  %v1563_v17 = vld [vmem:[%s2294_s4 + $0x10] sm:$0x3]  ;;  %v575_v19 = vpack.c.bf16 %v1543_v6, %v1543_v6  ;;  %v1551_v21 = vld [vmem:[%s2032_s20 + $0x19] sm:$0xff] }
  0x1e   : > { %v573_v10 = vpack.c.bf16 %v1540_v58, %v1514_v7  ;;  %v1094_v20 = vsel %vm438_vm0, %v1563_v17, 0  ;;  %v1552_v22 = vld [vmem:[%s2032_s20 + $0x21] sm:$0xff]  ;;  %v1553_v27 = vld [vmem:[%s2032_s20 + $0x29] sm:$0xff]  ;;  %v1559_v33 = vld [vmem:[%s2091_s15 + $0x12] sm:$0xff]  ;;  %s1833_s20 = smul.u32 10, %s2309_s25 }
  0x1f   : > { %v1200_v50 = vadd.f32 %v1199_v47, %v1198_v45  ;;  %v653_v24 = vld [vmem:[%s2066_s16 + $0x8] sm:$0xff]  ;;  %v995_v25 = vpack.c.bf16 %v1552_v22, %v1551_v21  ;;  %v654_v28 = vld [vmem:[%s2066_s16 + $0x10] sm:$0xff]  ;;  %v1560_v36 = vld [vmem:[%s2091_s15 + $0x1a] sm:$0xff] }
  0x20   : > { %1622 = vmatmul.mubr.msk.bf16.gmra.mrb[4].mxu1 %vm428_vm2, %v424_v18  ;;  %v994_v18 = vpack.c.bf16 %v1550_v16, %v1549_v15  ;;  %v1558_v32 = vld [vmem:[%s2091_s15 + $0xa] sm:$0xff]  ;;  %v1561_v37 = vld [vmem:[%s2091_s15 + $0x22] sm:$0xff]  ;;  %v739_v39 = vld [vmem:[%s2045_s10 + $0x18] sm:$0xff] }
  0x21   : > { %1625 = vmatprep.mubr.msk.bf16.mxu1 %vm1922_vm1, %v1921_v2  ;;  %v1201_v53 = vrot.slane %v1200_v50, 2  ;;  %v1079_v34 = vpack.c.bf16 %v1559_v33, %v1558_v32  ;;  %v738_v38 = vld [vmem:[%s2045_s10 + $0x10] sm:$0xff]  ;;  %v1080_v40 = vpack.c.bf16 %v1561_v37, %v1560_v36 }
  0x22   : > { %v742_v41 = vpack.c.bf16 %v739_v39, %v738_v38  ;;  %v1562_v42 = vld [vmem:[%s2091_s15 + $0x2a] sm:$0xff] }
  0x23   : > { %v1202_v55 = vadd.f32 %v1201_v53, %v1200_v50  ;;  %v1081_v44 = vpack.c.bf16 %v1562_v42, %v1562_v42 }
  0x25   : > { %v1203_v57 = vrot.slane %v1202_v55, 1 }
  0x26   : > { %1688 = vmatmul.mubr.msk.bf16.vlgmr.msra.gmra.mrb[0].mxu0 %vm428_vm2, %v825_v23  ;;  %v652_v23 = vld [vmem:[%s2066_s16] sm:$0xff] }
  0x27   : > { %1700 = vmatpush3.bf16.msra.mxu0 %v925_v30  ;;  %1691 = vmatprep.mubr.msk.bf16.mxu0 %vm1922_vm1, %v1921_v2  ;;  %v1204_v60 = vadd.f32 %v1203_v57, %v1202_v55  ;;  %v657_v26 = vpack.c.bf16 %v653_v24, %v652_v23  ;;  %v996_v30 = vpack.c.bf16 %v1553_v27, %v1553_v27 }
  0x28   : > { %1626 = vmatmul.mubr.msk.bf16.gmra.mrb[8].mxu1 %vm428_vm2, %v425_v29  ;;  %1713 = vmatprep.subr.bf16.mxu0 %v1921_v2  ;;  %v655_v29 = vld [vmem:[%s2066_s16 + $0x18] sm:$0xff] }
  0x29   : > { %1631 = vmatprep.mubr.msk.bf16.mxu1 %vm1922_vm1, %v1921_v2  ;;  %v1205_v63 = vmax.f32 %v1204_v60, 1.0  ;;  %v658_v31 = vpack.c.bf16 %v655_v29, %v654_v28 }
  0x2b   : > { %1254 = vperm.xlu1 %1878, %v1205_v63  }
  0x2e   : > { %1692 = vmatmul.mubr.msk.bf16.gmra.mrb[4].mxu0 %vm428_vm2, %v826_v43  ;;  %v740_v43 = vld [vmem:[%s2045_s10 + $0x20] sm:$0xff] }
  0x2f   : > { %1695 = vmatprep.mubr.msk.bf16.mxu0 %vm1922_vm1, %v1921_v2  ;;  %v743_v45 = vpack.c.bf16 %v740_v43, %v740_v43 }
  0x30   : > { %1632 = vmatmul.mubr.msk.bf16.vlgmr.msra.gmra.mrb[0].mxu1 %vm428_vm2, %v413_v46 }
  0x31   : > { %1644 = vmatpush3.bf16.msra.mxu1 %v588_v48  ;;  %1635 = vmatprep.mubr.msk.bf16.mxu1 %vm1922_vm1, %v1921_v2 }
  0x32   : > { %1657 = vmatprep.subr.bf16.mxu1 %v1921_v2 }
  0x36   : > { %1696 = vmatmul.mubr.msk.bf16.gmra.mrb[8].mxu0 %vm428_vm2, %v827_v54 }
  0x37   : > { %1701 = vmatprep.mubr.msk.bf16.mxu0 %vm1922_vm1, %v1921_v2 }
  0x38   : > { %1636 = vmatmul.mubr.msk.bf16.gmra.mrb[4].mxu1 %vm428_vm2, %v414_v56 }
  0x39   : > { %1639 = vmatprep.mubr.msk.bf16.mxu1 %vm1922_vm1, %v1921_v2 }
  0x3e   : > { %1702 = vmatmul.mubr.msk.bf16.vlgmr.msra.gmra.mrb[0].mxu0 %vm428_vm2, %v910_v0 }
  0x3f   : > { %1714 = vmatpush3.bf16.msra.mxu0 %v1009_v3  ;;  %1705 = vmatprep.mubr.msk.bf16.mxu0 %vm1922_vm1, %v1921_v2 }
  0x40   : > { %1640 = vmatmul.mubr.msk.bf16.gmra.mrb[8].mxu1 %vm428_vm2, %v415_v1  ;;  %1727 = vmatprep.subr.bf16.mxu0 %v1921_v2 }
  0x41   : > { %1645 = vmatprep.mubr.msk.bf16.mxu1 %vm1922_vm1, %v1921_v2 }
  0x46   : > { %1706 = vmatmul.mubr.msk.bf16.gmra.mrb[4].mxu0 %vm428_vm2, %v911_v8 }
  0x47   : > { %1709 = vmatprep.mubr.msk.bf16.mxu0 %vm1922_vm1, %v1921_v2 }
  0x48   : > { %1646 = vmatmul.mubr.msk.bf16.vlgmr.msra.gmra.mrb[0].mxu1 %vm428_vm2, %v573_v10 }
  0x49   : > { %1658 = vmatpush3.bf16.msra.mxu1 %v672_v11  ;;  %1649 = vmatprep.mubr.msk.bf16.mxu1 %vm1922_vm1, %v1921_v2 }
  0x4a   : > { %1741 = vmatprep.subr.bf16.mxu1 %v1921_v2 }
  0x4e   : > { %1710 = vmatmul.mubr.msk.bf16.gmra.mrb[8].mxu0 %vm428_vm2, %v912_v13 }
  0x4f   : > { %1715 = vmatprep.mubr.msk.bf16.mxu0 %vm1922_vm1, %v1921_v2 }
  0x50   : > { %1650 = vmatmul.mubr.msk.bf16.gmra.mrb[4].mxu1 %vm428_vm2, %v574_v14 }
  0x51   : > { %1653 = vmatprep.mubr.msk.bf16.mxu1 %vm1922_vm1, %v1921_v2 }
  0x56   : > { %1716 = vmatmul.mubr.msk.bf16.vlgmr.msra.gmra.mrb[0].mxu0 %vm428_vm2, %v994_v18 }
  0x57   : > { %1728 = vmatpush3.bf16.msra.mxu0 %v1094_v20  ;;  %1719 = vmatprep.mubr.msk.bf16.mxu0 %vm1922_vm1, %v1921_v2 }
  0x58   : > { %1654 = vmatmul.mubr.msk.bf16.gmra.mrb[8].mxu1 %vm428_vm2, %v575_v19 }
  0x59   : > { %1659 = vmatprep.mubr.msk.bf16.mxu1 %vm1922_vm1, %v1921_v2 }
  0x5e   : > { %1720 = vmatmul.mubr.msk.bf16.gmra.mrb[4].mxu0 %vm428_vm2, %v995_v25 }
  0x5f   : > { %1723 = vmatprep.mubr.msk.bf16.mxu0 %vm1922_vm1, %v1921_v2 }
  0x60   : > { %1660 = vmatmul.mubr.msk.bf16.vlgmr.msra.gmra.mrb[0].mxu1 %vm428_vm2, %v657_v26 }
  0x61   : > { %1742 = vmatpush3.bf16.msra.mxu1 %v2006_v4  ;;  %1663 = vmatprep.mubr.msk.bf16.mxu1 %vm1922_vm1, %v1921_v2  ;;  %v656_v4 = vld [vmem:[%s2066_s16 + $0x20] sm:$0xff]  ;;  %s393_s16 = sadd.s32 %s1833_s20, %s2311_s19  ;;  %s1505_s19 = sshll.u32 %s2309_s25, 1 }
  0x62   : > { %v659_v35 = vpack.c.bf16 %v656_v4, %v656_v4  ;;  %s1504_s9 = sshll.u32 %s393_s16, 2  ;;  %s402_s15 = sadd.s32 %s1505_s19, %s2313_s24 }
  0x63   : > { %s2225_s14 = scalar_lea.vmem %s2296_s6, %s1504_s9  ;;  %s1506_s12 = sshll.u32 %s402_s15, 1 }
  0x64   : > { %s2260_s18 = scalar_lea.vmem %s2297_s7, %s1506_s12 }
  0x66   : > { %1724 = vmatmul.mubr.msk.bf16.gmra.mrb[8].mxu0 %vm428_vm2, %v996_v30 }
  0x67   : > { %1729 = vmatprep.mubr.msk.bf16.mxu0 %vm1922_vm1, %v1921_v2 }
  0x68   : > { %1664 = vmatmul.mubr.msk.bf16.gmra.mrb[4].mxu1 %vm428_vm2, %v658_v31 }
  0x69   : > { %1667 = vmatprep.mubr.msk.bf16.mxu1 %vm1922_vm1, %v1921_v2 }
  0x6e   : > { %1730 = vmatmul.mubr.msk.bf16.vlgmr.msra.gmra.mrb[0].mxu0 %vm428_vm2, %v1079_v34 }
  0x6f   : > { %1733 = vmatprep.mubr.msk.bf16.mxu0 %vm1922_vm1, %v1921_v2 }
  0x70   : > { %1668 = vmatmul.mubr.msk.bf16.gmra.mrb[8].mxu1 %vm428_vm2, %v659_v35 }
  0x71   : > { %1677 = vmatprep.mubr.msk.bf16.mxu1 %vm1922_vm1, %v1921_v2 }
  0x76   : > { %1734 = vmatmul.mubr.msk.bf16.gmra.mrb[4].mxu0 %vm428_vm2, %v1080_v40 }
  0x77   : > { %1737 = vmatprep.mubr.msk.bf16.mxu0 %vm1922_vm1, %v1921_v2 }
  0x78   : > { %1678 = vmatmul.mubr.msk.bf16.vlgmr.msra.gmra.mrb[4].mxu1 %vm428_vm2, %v742_v41 }
  0x79   : > { %1681 = vmatprep.mubr.msk.bf16.mxu1 %vm1922_vm1, %v1921_v2 }
  0x7e   : > { %1738 = vmatmul.mubr.msk.bf16.gmra.mrb[8].mxu0 %vm428_vm2, %v1081_v44 }
  0x80   : > { %1682 = vmatmul.mubr.msk.bf16.gmra.mrb[8].mxu1 %vm428_vm2, %v743_v45 }
  0x93   : > { %v2218_v50 = vpop.permute.xlu0 %1208  ;;  %v1219_v0 = vpop.permute.xlu1 %1218 }
  0x97   : > { %v2227_v54 = vpop.permute.xlu0 %1213 }
  0x9b   : > { %v1224_v15 = vpop.permute.xlu1 %1223 }
  0x9c   : > { %v1229_v29 = vpop.permute.xlu0 %1228 }
  0xaa   : > { %v1255_v34 = vpop.permute.xlu1 %1254 }
  0xab   : > { %1879 = vrcp.f32 %v1255_v34 }
  0xb5   : > { %v1880_v42 = vpop.eup %1879 }
 0x133   : > { %v708_v46 = vpop.f32.mrb[0].mxu1 }
 0x134   : > { %v1661_v47 = vpop.f32.mrb[1].mxu1 }
 0x135   : > { %v711_v48 = vpop.f32.mrb[2].mxu1 }
 0x136   : > { %v1662_v49 = vpop.f32.mrb[3].mxu1 }
 0x141   : > { %v1130_v51 = vpop.f32.mrb[0].mxu0 }
 0x142   : > { %v2220_v52 = vadd.f32 %v1130_v51, %v708_v46  ;;  %v1731_v2 = vpop.f32.mrb[1].mxu0 }
 0x143   : > { %v1133_v53 = vpop.f32.mrb[2].mxu0 }
 0x144   : > { %v1574_v55 = vpack.c.bf16 %v2220_v52, %v2220_v52  ;;  %v1231_v56 = vmul.f32 %v2220_v52, %v2218_v50  ;;  %v2233_v57 = vadd.f32 %v1133_v53, %v711_v48  ;;  %v1732_v58 = vpop.f32.mrb[3].mxu0 }
 0x146   : > { %1179 = vst.msk [vmem:[%s2225_s14] sm:$0xf] %vm1178_vm4, %v1574_v55  ;;  %v1575_v59 = vpack.c.bf16 %v2233_v57, %v2233_v57  ;;  %v1232_v60 = vmul.f32 %v2233_v57, %v2227_v54  ;;  %v1237_v61 = vsel %vm1236_vm5, %v1231_v56, 0.0 }
 0x148   : > { %1180 = vst.msk [vmem:[%s2225_s14 + $0x4] sm:$0xf] %vm1178_vm4, %v1575_v59  ;;  %v1238_v62 = vsel %vm1236_vm5, %v1232_v60, 0.0 }
 0x149   : > { %v1239_v63 = vadd.f32 %v1238_v62, %v1237_v61  ;;  %v1138_v1 = vpop.f32.mrb[4].mxu0 }
 0x14a   : > { %v1735_v3 = vpop.f32.mrb[5].mxu0 }
 0x14b   : > { %v1141_v5 = vpop.f32.mrb[6].mxu0  ;;  %v800_v6 = vpop.f32.mrb[4].mxu1 }
 0x14c   : > { %v1736_v7 = vpop.f32.mrb[7].mxu0  ;;  %v1745_v8 = vadd.f32 %v1138_v1, %v800_v6  ;;  %v1679_v9 = vpop.f32.mrb[5].mxu1 }
 0x14d   : > { %v803_v10 = vpop.f32.mrb[6].mxu1 }
 0x14e   : > { %v1576_v11 = vpack.c.bf16 %v1745_v8, %v1745_v8  ;;  %v1233_v12 = vmul.f32 %v1745_v8, %v1219_v0  ;;  %v1746_v13 = vadd.f32 %v1141_v5, %v803_v10  ;;  %v1680_v14 = vpop.f32.mrb[7].mxu1 }
 0x150   : > { %1181 = vst.msk [vmem:[%s2225_s14 + $0x8] sm:$0xf] %vm1178_vm4, %v1576_v11  ;;  %v1240_v16 = vsel %vm1236_vm5, %v1233_v12, 0.0  ;;  %v1577_v17 = vpack.c.bf16 %v1746_v13, %v1746_v13  ;;  %v1234_v18 = vmul.f32 %v1746_v13, %v1224_v15 }
 0x151   : > { %v1241_v19 = vadd.f32 %v1240_v16, %v1239_v63  ;;  %v1146_v20 = vpop.f32.mrb[8].mxu0 }
 0x152   : > { %1182 = vst.msk [vmem:[%s2225_s14 + $0xc] sm:$0xf] %vm1178_vm4, %v1577_v17  ;;  %v1242_v21 = vsel %vm1236_vm5, %v1234_v18, 0.0  ;;  %v1739_v22 = vpop.f32.mrb[9].mxu0 }
 0x153   : > { %v1243_v23 = vadd.f32 %v1242_v21, %v1241_v19  ;;  %v1149_v24 = vpop.f32.mrb[10].mxu0  ;;  %v808_v25 = vpop.f32.mrb[8].mxu1 }
 0x154   : > { %v1740_v26 = vpop.f32.mrb[11].mxu0  ;;  %v1747_v27 = vadd.f32 %v1146_v20, %v808_v25  ;;  %v1683_v28 = vpop.f32.mrb[9].mxu1 }
 0x155   : > { %v811_v30 = vpop.f32.mrb[10].mxu1 }
 0x156   : > { %v1578_v31 = vpack.c.bf16 %v1747_v27, %v1747_v27  ;;  %v1235_v32 = vmul.f32 %v1747_v27, %v1229_v29  ;;  %v1684_v33 = vpop.f32.mrb[11].mxu1 }
 0x158   : > { %1183 = vst.msk [vmem:[%s2225_s14 + $0x10] sm:$0xf] %vm1178_vm4, %v1578_v31  ;;  %v1244_v4 = vsel %vm1236_vm5, %v1235_v32, 0.0 }
 0x159   : > { %v1245_v35 = vadd.f32 %v1244_v4, %v1243_v23 }
 0x15b   : > { %v1246_v36 = vrot.slane %v1245_v35, 4 }
 0x15d   : > { %v1247_v37 = vadd.f32 %v1246_v36, %v1245_v35 }
 0x15f   : > { %v1248_v38 = vrot.slane %v1247_v37, 2 }
 0x161   : > { %v1249_v39 = vadd.f32 %v1248_v38, %v1247_v37 }
 0x163   : > { %v1250_v40 = vrot.slane %v1249_v39, 1 }
 0x165   : > { %v1251_v41 = vadd.f32 %v1250_v40, %v1249_v39 }
 0x167   : > { %v1258_v43 = vmul.f32 %v1880_v42, %v1251_v41  ;;  %1270 = vst.msk [vmem:[%s2260_s18] sm:$0x1] %vm1269_vm6, %v1251_v41 }
 0x169   : > { %v1259_v44 = vsub.f32 %v2220_v52, %v1258_v43  ;;  %v1260_v45 = vsub.f32 %v2233_v57, %v1258_v43  ;;  %v1261_v46 = vsub.f32 %v1745_v8, %v1258_v43  ;;  %v1262_v47 = vsub.f32 %v1746_v13, %v1258_v43 }
 0x16a   : > { %v1263_v48 = vsub.f32 %v1747_v27, %v1258_v43 }
 0x16b   : > { %v1264_v49 = vmul.f32 %v1259_v44, %v2218_v50  ;;  %v1265_v51 = vmul.f32 %v1260_v45, %v2227_v54  ;;  %v1266_v2 = vmul.f32 %v1261_v46, %v1219_v0  ;;  %v1267_v53 = vmul.f32 %v1262_v47, %v1224_v15 }
 0x16c   : > { %v1268_v55 = vmul.f32 %v1263_v48, %v1229_v29 }
 0x16d   : > { %v1271_v56 = vmul.f32 %v1264_v49, %v1264_v49  ;;  %v1272_v58 = vmul.f32 %v1265_v51, %v1265_v51  ;;  %v1273_v59 = vmul.f32 %v1266_v2, %v1266_v2  ;;  %v1274_v60 = vmul.f32 %v1267_v53, %v1267_v53 }
 0x16e   : > { %v1275_v62 = vmul.f32 %v1268_v55, %v1268_v55 }
 0x16f   : > { %v1276_v61 = vsel %vm1236_vm5, %v1271_v56, 0.0  ;;  %v1277_v52 = vsel %vm1236_vm5, %v1272_v58, 0.0  ;;  %v1279_v63 = vsel %vm1236_vm5, %v1273_v59, 0.0  ;;  %v1281_v50 = vsel %vm1236_vm5, %v1274_v60, 0.0 }
 0x170   : > { %v1278_v57 = vadd.f32 %v1277_v52, %v1276_v61  ;;  %v1283_v0 = vsel %vm1236_vm5, %v1275_v62, 0.0 }
 0x172   : > { %v1280_v1 = vadd.f32 %v1279_v63, %v1278_v57 }
 0x174   : > { %v1282_v54 = vadd.f32 %v1281_v50, %v1280_v1 }
 0x176   : > { %v1284_v3 = vadd.f32 %v1283_v0, %v1282_v54 }
 0x178   : > { %v1285_v5 = vrot.slane %v1284_v3, 4 }
 0x17a   : > { %v1286_v6 = vadd.f32 %v1285_v5, %v1284_v3 }
 0x17c   : > { %v1287_v7 = vrot.slane %v1286_v6, 2 }
 0x17e   : > { %v1288_v8 = vadd.f32 %v1287_v7, %v1286_v6 }
 0x180   : > { %v1289_v9 = vrot.slane %v1288_v8, 1 }
 0x182   : > { %v1290_v10 = vadd.f32 %v1289_v9, %v1288_v8 }
 0x184   : > { %1291 = vst.msk [vmem:[%s2260_s18 + $0x1] sm:$0x1] %vm1269_vm6, %v1290_v10 }
 0x185 PF: > { %s18_s28 = sadd.s32 1, %s1919_s28   ;;  %s2298_s24 = smov %s1911_s26 }
 0x186   : > { %p15_p8 = scmp.ge.s32.totalorder %s18_s28, 6   ;;  %s2299_s25 = smov %s1915_s27 }
 0x187   : > { %s2300_s26 = smov %s2303_s29  ;;  %s2301_s27 = smov %s2307_s30 }
 0x188   :  { %17 = sbr.rel (!%p15_p8) target bundleno = 3 (0x3), region = 115 }

// kernel: encoder_block.11
= control target key start
LH: loop header
LB: loop body
LE: loop exit
PB: predicated region body
PF: predicated region fallthrough
CT: control target
= control target key end

     0   :  { %s608_s15 = smov 0   ;;  %s610_s16 = smov 0   ;;  %s673_s0 = inlined_call_operand.vmem [shape: bf16[2,80,8], index: 0, kind: input, shape index: {}, may-alias: {0,4}]   ;;  %s674_s1 = inlined_call_operand.vmem [shape: f32[1,8], index: 1, kind: input, shape index: {}]   ;;  %s675_s2 = inlined_call_operand.vmem [shape: f32[1,8], index: 2, kind: input, shape index: {}]   ;;  %s676_s3 = inlined_call_operand.vmem [shape: bf16[2,80,8], index: 3, kind: input, shape index: {}]   ;;  %s677_s4 = inlined_call_operand.vmem [shape: bf16[2,80,8], index: 4, kind: output, shape index: {}, may-alias: {0,4}]  }
   0x1   :  { %s612_s17 = smov 0   ;;  %s614_s18 = smov 0  }
   0x2   :  { %s616_s19 = smov 0  }
   0x3 LB: > { %s23_s20 = sadd.s32 1, %s573_s17  ;;  %s26_s21 = sadd.s32 1, %s577_s18  ;;  %s581_s19 = sphi %s616_s19, %s14_s19   ;;  %s577_s18 = sphi %s614_s18, %s681_s18   ;;  %s573_s17 = sphi %s612_s17, %s680_s17   ;;  %s569_s16 = sphi %s610_s16, %s679_s16   ;;  %s565_s15 = sphi %s608_s15, %s678_s15  }
   0x4   : > { %p24_p0 = scmp.ge.s32.totalorder %s23_s20, 2  ;;  %p466_p1 = scmp.ge.s32.totalorder %s581_s19, 1 }
   0x5   : > { %p200_p2 = scmp.lt.s32.totalorder %s581_s19, 5 }
   0x6   : > { %s683_s20 = smov (%p24_p0, %s23_s20), 0  ;;  %s685_s21 = smov (!%p24_p0, %s26_s21), %s577_s18 }
   0x7   : > { %p201_p3 = pnand %p466_p1, %p200_p2  ;;  %p28_p4 = scmp.ge.s32.totalorder %s685_s21, 2 }
   0x8   : > { %s243_s22 = smul.u32 (!%p201_p3), 5, %s565_s15  ;;  %p244_p5 = scmp.lt.s32.totalorder (!%p201_p3), %s569_s16, 1  ;;  %v470_v0 = vld [vmem:[%s674_s1] ss:$0 sm:$0xff] (!%p201_p3)  ;;  %vm348_vm0 = vcmask (!%p201_p3), 60416  }
   0x9   : > { %s687_s21 = smov (%p28_p4, %s685_s21), 0  ;;  %204 = sbr.rel (%p201_p3) target bundleno = 38 (0x26), region = 36 }
   0xa   : > { %p246_p6 = scmp.lt.s32.totalorder (!%p201_p3), %s243_s22, 9  ;;  %v471_v10 = vld [vmem:[%s675_s2] ss:$0 sm:$0xff] (!%p201_p3) }
  0x10   : > { %s689_s16 = smov (!%p244_p5, %s569_s16), 1  ;;  %s691_s22 = smov (!%p246_p6, %s243_s22), 9 }
  0x11   : > { %s502_s23 = smul.u32 10, %s689_s16 }
  0x13   : > { %s249_s24 = sadd.s32 %s502_s23, %s691_s22 }
  0x14   : > { %s638_s25 = sshll.u32 %s249_s24, 2 }
  0x15   : > { %s251_s28 = scalar_lea.vmem %s673_s0, %s638_s25  ;;  %s261_s5 = scalar_lea.vmem %s676_s3, %s638_s25 }
  0x16   : > { %v485_v1 = vld [vmem:[%s251_s28] sm:$0xff]   ;;  %v500_v2 = vld [vmem:[%s251_s28 + $0x8] sm:$0xff]   ;;  %v277_v3 = vld [vmem:[%s251_s28 + $0x10] sm:$0xf]  ;;  %s271_s12 = scalar_lea.vmem %s677_s4, %s638_s25 }
  0x17   : > { %v486_v4 = vunpack.c.l.bf16 %v485_v1  ;;  %v487_v5 = vunpack.c.h.bf16 %v485_v1  ;;  %v490_v6 = vunpack.c.l.bf16 %v500_v2  ;;  %v491_v7 = vunpack.c.h.bf16 %v500_v2  ;;  %v493_v8 = vld [vmem:[%s261_s5] sm:$0xff]   ;;  %v501_v11 = vld [vmem:[%s261_s5 + $0x8] sm:$0xff]   ;;  %v316_v14 = vld [vmem:[%s261_s5 + $0x10] sm:$0xf] }
  0x18   : > { %v282_v9 = vunpack.c.l.bf16 %v277_v3  ;;  %v494_v13 = vunpack.c.l.bf16 %v493_v8  ;;  %v495_v17 = vunpack.c.h.bf16 %v493_v8  ;;  %v498_v21 = vunpack.c.l.bf16 %v501_v11 }
  0x19   : > { %v290_v12 = vmul.f32 %v486_v4, %v470_v0  ;;  %v291_v15 = vmul.f32 %v487_v5, %v470_v0  ;;  %v292_v18 = vmul.f32 %v490_v6, %v470_v0  ;;  %v293_v19 = vmul.f32 %v491_v7, %v470_v0 }
  0x1a   : > { %v294_v16 = vmul.f32 %v470_v0, %v282_v9  ;;  %v499_v22 = vunpack.c.h.bf16 %v501_v11  ;;  %v321_v25 = vunpack.c.l.bf16 %v316_v14 }
  0x1b   : > { %v302_v20 = vadd.f32 %v471_v10, %v290_v12  ;;  %v303_v23 = vadd.f32 %v471_v10, %v291_v15  ;;  %v304_v26 = vadd.f32 %v471_v10, %v292_v18  ;;  %v305_v27 = vadd.f32 %v471_v10, %v293_v19 }
  0x1c   : > { %v306_v24 = vadd.f32 %v471_v10, %v294_v16 }
  0x1d   : > { %v307_v28 = vmax.f32 %v302_v20, 0.0  ;;  %v308_v29 = vmax.f32 %v303_v23, 0.0  ;;  %v309_v31 = vmax.f32 %v304_v26, 0.0  ;;  %v310_v32 = vmax.f32 %v305_v27, 0.0 }
  0x1e   : > { %v311_v30 = vmax.f32 %v306_v24, 0.0 }
  0x1f   : > { %v322_v33 = vadd.f32 %v494_v13, %v307_v28  ;;  %v323_v34 = vadd.f32 %v495_v17, %v308_v29  ;;  %v324_v36 = vadd.f32 %v498_v21, %v309_v31  ;;  %v325_v37 = vadd.f32 %v499_v22, %v310_v32 }
  0x20   : > { %v326_v35 = vadd.f32 %v321_v25, %v311_v30 }
  0x21   : > { %v479_v38 = vpack.c.bf16 %v322_v33, %v322_v33  ;;  %v480_v39 = vpack.c.bf16 %v323_v34, %v323_v34  ;;  %v481_v40 = vpack.c.bf16 %v324_v36, %v324_v36  ;;  %v482_v41 = vpack.c.bf16 %v325_v37, %v325_v37 }
  0x22   : > { %v483_v42 = vpack.c.bf16 %v326_v35, %v326_v35 }
  0x23   : > { %349 = vst.msk [vmem:[%s271_s12] sm:$0xf] %vm348_vm0, %v479_v38  ;;  %350 = vst.msk [vmem:[%s271_s12 + $0x4] sm:$0xf] %vm348_vm0, %v480_v39 }
  0x24   : > { %351 = vst.msk [vmem:[%s271_s12 + $0x8] sm:$0xf] %vm348_vm0, %v481_v40  ;;  %352 = vst.msk [vmem:[%s271_s12 + $0xc] sm:$0xf] %vm348_vm0, %v482_v41 }
  0x25   : > { %353 = vst.msk [vmem:[%s271_s12 + $0x10] sm:$0xf] %vm348_vm0, %v483_v42 }
  0x26 PF: > { %s14_s19 = sadd.s32 1, %s581_s19   ;;  %s678_s15 = smov %s573_s17 }
  0x27   : > { %p11_p7 = scmp.ge.s32.totalorder %s14_s19, 6   ;;  %s679_s16 = smov %s577_s18 }
  0x28   : > { %s680_s17 = smov %s683_s20  ;;  %s681_s18 = smov %s687_s21 }
  0x29   :  { %13 = sbr.rel (!%p11_p7) target bundleno = 3 (0x3), region = 69 }

// kernel: encoder_block.10
= control target key start
LH: loop header
LB: loop body
LE: loop exit
PB: predicated region body
PF: predicated region fallthrough
CT: control target
= control target key end

     0   :  { %s1791_s15 = smov 0   ;;  %s1793_s16 = smov 0   ;;  %s2090_s0 = inlined_call_operand.vmem [shape: f32[2,104,8], index: 0, kind: input, shape index: {}]   ;;  %s2091_s1 = inlined_call_operand.vmem [shape: bf16[9,8,8], index: 1, kind: input, shape index: {}]   ;;  %s2092_s2 = inlined_call_operand.vmem [shape: f32[80,1], index: 2, kind: input, shape index: {}]   ;;  %s2093_s3 = inlined_call_operand.vmem [shape: bf16[2,80,8], index: 3, kind: output, shape index: {0}]   ;;  %s2094_s4 = inlined_call_operand.vmem [shape: f32[2,2,2,8], index: 4, kind: output, shape index: {1}]  }
   0x1   :  { %s1795_s17 = smov 0   ;;  %s1797_s18 = smov 0  }
   0x2   :  { %s1799_s19 = smov 0  }
   0x3 LB: > { %s24_s20 = sadd.s32 1, %s1753_s17  ;;  %s27_s21 = sadd.s32 1, %s1757_s18  ;;  %s1761_s19 = sphi %s1799_s19, %s15_s19   ;;  %s1757_s18 = sphi %s1797_s18, %s2098_s18   ;;  %s1753_s17 = sphi %s1795_s17, %s2097_s17   ;;  %s1749_s16 = sphi %s1793_s16, %s2096_s16   ;;  %s1745_s15 = sphi %s1791_s15, %s2095_s15  }
   0x4   : > { %p25_p0 = scmp.ge.s32.totalorder %s24_s20, 2  ;;  %p1328_p1 = scmp.ge.s32.totalorder %s1761_s19, 1 }
   0x5   : > { %p192_p2 = scmp.lt.s32.totalorder %s1761_s19, 5 }
   0x6   : > { %s2100_s20 = smov (%p25_p0, %s24_s20), 0  ;;  %s2102_s21 = smov (!%p25_p0, %s27_s21), %s1757_s18 }
   0x7   : > { %p193_p3 = pnand %p1328_p1, %p192_p2  ;;  %p29_p4 = scmp.ge.s32.totalorder %s2102_s21, 2 }
   0x8   : > { %v1339_v0 = vld [vmem:[%s2091_s1 + $0x4] sm:$0xf] (!%p193_p3)  ;;  %vm298_vm0 = vcmask (!%p193_p3), 1043456   ;;  %v1369_v1 = vld [vmem:[%s2091_s1 + $0x10] sm:$0xf] (!%p193_p3)  ;;  %v1763_v2 = vmov (!%p193_p3), 0.0  }
   0x9   : > { %s2104_s21 = smov (%p29_p4, %s2102_s21), 0  ;;  %196 = sbr.rel (%p193_p3) target bundleno = 389 (0x185), region = 32 }
   0xa   : > { %1457 = vmatprep.subr.bf16.mxu1 (!%p193_p3), %v1763_v2  ;;  %v300_v3 = vsel (!%p193_p3), %vm298_vm0, %v1339_v0, 0  ;;  %1513 = vmatprep.subr.bf16.mxu0 (!%p193_p3), %v1763_v2  ;;  %v1833_v4 = vsel (!%p193_p3), %vm298_vm0, %v1369_v1, 0  ;;  %p235_p5 = scmp.lt.s32.totalorder (!%p193_p3), %s1749_s16, 1  ;;  %vm1764_vm1 = vmmov (!%p193_p3), 0   ;;  %s265_s26 = smul.u32 (!%p193_p3), 40, %s1745_s15  ;;  %v1765_v5 = vmov (!%p193_p3), 0  }
   0xb   : > { %1458 = vmatpush3.bf16.msra.mxu1 (!%p193_p3), %v300_v3  ;;  %1514 = vmatpush3.bf16.msra.mxu0 (!%p193_p3), %v1833_v4  ;;  %s240_s28 = smul.u32 (!%p193_p3), 5, %s1745_s15  ;;  %v275_v6 = vld [vmem:[%s2091_s1] sm:$0xf] (!%p193_p3)  ;;  %v1378_v7 = vld [vmem:[%s2091_s1 + $0x14] sm:$0xf] (!%p193_p3)  ;;  %vm288_vm2 = vcmask (!%p193_p3), 64512  }
   0xc   : > { %1459 = vmatprep.mubr.msk.bf16.mxu1 (!%p193_p3), %vm1764_vm1, %v1763_v2  ;;  %1471 = vmatprep.subr.bf16.mxu1 (!%p193_p3), %v1763_v2  ;;  %v368_v12 = vsel (!%p193_p3), %vm298_vm0, %v275_v6, 0  ;;  %v703_v15 = vsel (!%p193_p3), %vm298_vm0, %v1378_v7, 0  ;;  %vm1053_vm3 = vcmask (!%p193_p3), 7168   ;;  %v1387_v21 = vld [vmem:[%s2091_s1 + $0x18] sm:$0xf] (!%p193_p3)  ;;  %vm1042_vm4 = vcmask (!%p193_p3), 60416  }
   0xd   : > { %1515 = vmatprep.mubr.msk.bf16.mxu0 (!%p193_p3), %vm1764_vm1, %v1763_v2  ;;  %1527 = vmatprep.subr.bf16.mxu0 (!%p193_p3), %v1763_v2  ;;  %p241_p6 = scmp.lt.s32.totalorder (!%p193_p3), %s240_s28, 9  ;;  %v788_v30 = vsel (!%p193_p3), %vm298_vm0, %v1387_v21, 0  ;;  %v1351_v45 = vld [vmem:[%s2091_s1 + $0x8] sm:$0xf] (!%p193_p3)  ;;  %v1396_v60 = vld [vmem:[%s2091_s1 + $0x1c] sm:$0xf] (!%p193_p3) }
   0xe   : > { %1719 = vset.pattern.permute.xlu0 (!%p193_p3), %v1765_v5  ;;  %1720 = vset.pattern.permute.xlu1 (!%p193_p3), %v1765_v5  ;;  %v448_v49 = vsel (!%p193_p3), %vm298_vm0, %v1351_v45, 0  ;;  %v873_v63 = vsel (!%p193_p3), %vm298_vm0, %v1396_v60, 0  ;;  %v1360_v6 = vld [vmem:[%s2091_s1 + $0xc] sm:$0xf] (!%p193_p3)  ;;  %p258_p7 = scmp.lt.s32.totalorder (!%p193_p3), %s1745_s15, 1  ;;  %vm1132_vm5 = vcmask (!%p193_p3), 57344  }
  0x10   : > { %s2106_s16 = smov (!%p235_p5, %s1749_s16), 1  ;;  %s2108_s28 = smov (!%p241_p6, %s240_s28), 9 }
  0x11   : > { %s1674_s27 = smul.u32 104, %s2106_s16  ;;  %s1330_s11 = sshll.u32 %s2108_s28, 3 }
  0x12   : > { %s244_s14 = scalar_lea.vmem %s2092_s2, %s1330_s11  ;;  %s1675_s7 = smul.u32 10, %s2106_s16 }
  0x13   : > { %s239_s5 = scalar_lea.vmem %s2090_s0, %s1674_s27  ;;  %v1048_v24 = vld [vmem:[%s244_s14] sm:$0xff]  ;;  %v1049_v25 = vld [vmem:[%s244_s14 + $0x8] sm:$0xff]  ;;  %v1050_v28 = vld [vmem:[%s244_s14 + $0x10] sm:$0xff]  ;;  %s2110_s15 = smov (!%p258_p7, %s1745_s15), 1 }
  0x14   : > { %s1853_s8 = scalar_lea.vmem %s239_s5, %s265_s26  ;;  %1072 = vperm.xlu0 %1719, %v1048_v24   ;;  %v1054_v26 = vsel %vm1053_vm3, %v1048_v24, 0.0  ;;  %v1055_v27 = vsel %vm1053_vm3, %v1049_v25, 0.0  ;;  %v1051_v29 = vld [vmem:[%s244_s14 + $0x18] sm:$0xff]  ;;  %1082 = vperm.xlu1 %1720, %v1050_v28   ;;  %v1057_v32 = vsel %vm1053_vm3, %v1050_v28, 0.0  ;;  %v1052_v33 = vld [vmem:[%s244_s14 + $0x20] sm:$0xff]  ;;  %s252_s9 = sadd.s32 %s1675_s7, %s2108_s28 }
  0x15   : > { %v1334_v8 = vld [vmem:[%s1853_s8 + $0x1] sm:$0xff]  ;;  %v1335_v9 = vld [vmem:[%s1853_s8 + $0x9] sm:$0xff]  ;;  %v1365_v13 = vld [vmem:[%s1853_s8 + $0x13] sm:$0xff]  ;;  %v1056_v31 = vadd.f32 %v1055_v27, %v1054_v26  ;;  %v1059_v35 = vsel %vm1053_vm3, %v1051_v29, 0.0  ;;  %v1061_v39 = vsel %vm1053_vm3, %v1052_v33, 0.0  ;;  %s1331_s10 = sshll.u32 %s252_s9, 2 }
  0x16   : > { %v1364_v10 = vld [vmem:[%s1853_s8 + $0xb] sm:$0xff]  ;;  %v283_v11 = vpack.c.bf16 %v1335_v9, %v1334_v8  ;;  %v1337_v17 = vld [vmem:[%s1853_s8 + $0x19] sm:$0xff]  ;;  %v1338_v23 = vld [vmem:[%s1853_s8 + $0x21] sm:$0xff]  ;;  %v533_v8 = vsel %vm298_vm0, %v1360_v6, 0  ;;  %s2025_s12 = scalar_lea.vmem %s2093_s3, %s1331_s10  ;;  %s1332_s28 = sshll.u32 %s2106_s16, 1 }
  0x17   : > { %v603_v14 = vpack.c.bf16 %v1365_v13, %v1364_v10  ;;  %v1336_v16 = vld [vmem:[%s1853_s8 + $0x11] sm:$0xff]  ;;  %v285_v34 = vpack.c.bf16 %v1338_v23, %v1338_v23  ;;  %v1058_v36 = vadd.f32 %v1057_v32, %v1056_v31  ;;  %v1375_v37 = vld [vmem:[%s1853_s8 + $0x1c] sm:$0xff]  ;;  %v1376_v38 = vld [vmem:[%s1853_s8 + $0x24] sm:$0xff]  ;;  %s261_s13 = sadd.s32 %s1332_s28, %s2110_s15 }
  0x18   : > { %1460 = vmatmul.mubr.msk.bf16.vlgmr.msra.gmra.mrb[0].mxu1 %vm288_vm2, %v283_v11  ;;  %v284_v18 = vpack.c.bf16 %v1337_v17, %v1336_v16  ;;  %v1373_v19 = vld [vmem:[%s1853_s8 + $0xc] sm:$0xff]  ;;  %v1879_v20 = vld [vmem:[%s1853_s8 + $0x14] sm:$0xff]  ;;  %1077 = vperm.xlu0 %1719, %v1049_v25   ;;  %v689_v41 = vpack.c.bf16 %v1376_v38, %v1375_v37  ;;  %v267_v42 = vld [vmem:[%s1853_s8] sm:$0xff]  ;;  %s1333_s14 = sshll.u32 %s261_s13, 1 }
  0x19   : > { %1472 = vmatpush3.bf16.msra.mxu1 %v368_v12  ;;  %1516 = vmatmul.mubr.msk.bf16.vlgmr.msra.gmra.mrb[0].mxu0 %vm288_vm2, %v603_v14  ;;  %v688_v22 = vpack.c.bf16 %v1879_v20, %v1373_v19  ;;  %v1060_v40 = vadd.f32 %v1059_v35, %v1058_v36  ;;  %v268_v43 = vld [vmem:[%s1853_s8 + $0x8] sm:$0xff]  ;;  %v269_v53 = vld [vmem:[%s1853_s8 + $0x10] sm:$0xff]  ;;  %v270_v54 = vld [vmem:[%s1853_s8 + $0x18] sm:$0xff]  ;;  %v773_v61 = vpack.c.bf16 %v1375_v37, %v1879_v20  ;;  %s2060_s24 = scalar_lea.vmem %s2094_s4, %s1333_s14 }
  0x1a   : > { %1528 = vmatpush3.bf16.msra.mxu0 %v703_v15  ;;  %1463 = vmatprep.mubr.msk.bf16.mxu1 %vm1764_vm1, %v1763_v2  ;;  %v272_v47 = vpack.c.bf16 %v268_v43, %v267_v42  ;;  %v1377_v50 = vld [vmem:[%s1853_s8 + $0x2c] sm:$0xff]  ;;  %v273_v57 = vpack.c.bf16 %v270_v54, %v269_v53  ;;  %v271_v62 = vld [vmem:[%s1853_s8 + $0x20] sm:$0xff]  ;;  %v1386_v9 = vld [vmem:[%s1853_s8 + $0x34] sm:$0xff] }
  0x1b   : > { %1529 = vmatprep.mubr.msk.bf16.mxu0 %vm1764_vm1, %v1763_v2  ;;  %1541 = vmatprep.subr.bf16.mxu0 %v1763_v2  ;;  %v1062_v44 = vadd.f32 %v1061_v39, %v1060_v40  ;;  %v690_v52 = vpack.c.bf16 %v1377_v50, %v1377_v50  ;;  %v274_v0 = vpack.c.bf16 %v271_v62, %v271_v62  ;;  %v1346_v3 = vld [vmem:[%s1853_s8 + $0x2] sm:$0xff]  ;;  %v1347_v5 = vld [vmem:[%s1853_s8 + $0xa] sm:$0xff]  ;;  %v1348_v11 = vld [vmem:[%s1853_s8 + $0x12] sm:$0xff] }
  0x1c   : > { %1485 = vmatprep.subr.bf16.mxu1 %v1763_v2  ;;  %1087 = vperm.xlu1 %1720, %v1051_v29   ;;  %v774_v1 = vpack.c.bf16 %v1377_v50, %v1376_v38  ;;  %v433_v7 = vpack.c.bf16 %v1347_v5, %v1346_v3  ;;  %v775_v10 = vpack.c.bf16 %v1386_v9, %v1386_v9  ;;  %v1349_v12 = vld [vmem:[%s1853_s8 + $0x1a] sm:$0xff]  ;;  %v1393_v21 = vld [vmem:[%s1853_s8 + $0x25] sm:$0xff] }
  0x1d   : > { %1092 = vperm.xlu0 %1719, %v1052_v33   ;;  %v1063_v46 = vrot.slane %v1062_v44, 4  ;;  %v434_v13 = vpack.c.bf16 %v1349_v12, %v1348_v11  ;;  %v1391_v14 = vld [vmem:[%s1853_s8 + $0x15] sm:$0xff]  ;;  %v1392_v15 = vld [vmem:[%s1853_s8 + $0x1d] sm:$0xff]  ;;  %v518_v24 = vpack.c.bf16 %v1348_v11, %v1347_v5  ;;  %v1402_v32 = vld [vmem:[%s1853_s8 + $0x26] sm:$0xff] }
  0x1e   : > { %v1405_v16 = vld [vmem:[%s2091_s1 + $0x20] sm:$0xf]  ;;  %v858_v17 = vpack.c.bf16 %v1392_v15, %v1391_v14  ;;  %v1395_v25 = vld [vmem:[%s1853_s8 + $0x35] sm:$0xff]  ;;  %v1368_v40 = vld [vmem:[%s1853_s8 + $0x2b] sm:$0xff] }
  0x1f   : > { %v1064_v48 = vadd.f32 %v1063_v46, %v1062_v44  ;;  %v958_v19 = vsel %vm298_vm0, %v1405_v16, 0  ;;  %v860_v26 = vpack.c.bf16 %v1395_v25, %v1395_v25  ;;  %v1400_v28 = vld [vmem:[%s1853_s8 + $0x16] sm:$0xff]  ;;  %v1401_v29 = vld [vmem:[%s1853_s8 + $0x1e] sm:$0xff]  ;;  %v1403_v33 = vld [vmem:[%s1853_s8 + $0x2e] sm:$0xff] }
  0x20   : > { %1464 = vmatmul.mubr.msk.bf16.gmra.mrb[4].mxu1 %vm288_vm2, %v284_v18  ;;  %v1350_v18 = vld [vmem:[%s1853_s8 + $0x22] sm:$0xff]  ;;  %v1404_v38 = vld [vmem:[%s1853_s8 + $0x36] sm:$0xff] }
  0x21   : > { %1467 = vmatprep.mubr.msk.bf16.mxu1 %vm1764_vm1, %v1763_v2  ;;  %v1065_v51 = vrot.slane %v1064_v48, 2  ;;  %v435_v20 = vpack.c.bf16 %v1350_v18, %v1350_v18  ;;  %v519_v27 = vpack.c.bf16 %v1350_v18, %v1349_v12  ;;  %v1366_v35 = vld [vmem:[%s1853_s8 + $0x1b] sm:$0xff]  ;;  %v1367_v36 = vld [vmem:[%s1853_s8 + $0x23] sm:$0xff]  ;;  %v945_v39 = vpack.c.bf16 %v1404_v38, %v1404_v38 }
  0x22   : > { %v604_v37 = vpack.c.bf16 %v1367_v36, %v1366_v35 }
  0x23   : > { %v1066_v55 = vadd.f32 %v1065_v51, %v1064_v48 }
  0x25   : > { %1530 = vmatmul.mubr.msk.bf16.vlgmr.msra.gmra.mrb[0].mxu0 %vm288_vm2, %v688_v22  ;;  %v1067_v56 = vrot.slane %v1066_v55, 1  ;;  %v1394_v22 = vld [vmem:[%s1853_s8 + $0x2d] sm:$0xff] }
  0x26   : > { %1542 = vmatpush3.bf16.msra.mxu0 %v788_v30  ;;  %1533 = vmatprep.mubr.msk.bf16.mxu0 %vm1764_vm1, %v1763_v2  ;;  %v859_v23 = vpack.c.bf16 %v1394_v22, %v1393_v21  ;;  %v943_v30 = vpack.c.bf16 %v1401_v29, %v1400_v28 }
  0x27   : > { %1555 = vmatprep.subr.bf16.mxu0 %v1763_v2  ;;  %v1068_v58 = vadd.f32 %v1067_v56, %v1066_v55 }
  0x28   : > { %1468 = vmatmul.mubr.msk.bf16.gmra.mrb[8].mxu1 %vm288_vm2, %v285_v34  ;;  %v944_v34 = vpack.c.bf16 %v1403_v33, %v1402_v32 }
  0x29   : > { %1473 = vmatprep.mubr.msk.bf16.mxu1 %vm1764_vm1, %v1763_v2  ;;  %v1069_v59 = vmax.f32 %v1068_v58, 1.0 }
  0x2b   : > { %1117 = vperm.xlu1 %1720, %v1069_v59  }
  0x2d   : > { %1534 = vmatmul.mubr.msk.bf16.gmra.mrb[4].mxu0 %vm288_vm2, %v689_v41  ;;  %v605_v41 = vpack.c.bf16 %v1368_v40, %v1368_v40 }
  0x2e   : > { %1537 = vmatprep.mubr.msk.bf16.mxu0 %vm1764_vm1, %v1763_v2 }
  0x30   : > { %1474 = vmatmul.mubr.msk.bf16.vlgmr.msra.gmra.mrb[0].mxu1 %vm288_vm2, %v272_v47 }
  0x31   : > { %1486 = vmatpush3.bf16.msra.mxu1 %v448_v49  ;;  %1477 = vmatprep.mubr.msk.bf16.mxu1 %vm1764_vm1, %v1763_v2 }
  0x32   : > { %1499 = vmatprep.subr.bf16.mxu1 %v1763_v2 }
  0x35   : > { %1538 = vmatmul.mubr.msk.bf16.gmra.mrb[8].mxu0 %vm288_vm2, %v690_v52 }
  0x36   : > { %1543 = vmatprep.mubr.msk.bf16.mxu0 %vm1764_vm1, %v1763_v2 }
  0x38   : > { %1478 = vmatmul.mubr.msk.bf16.gmra.mrb[4].mxu1 %vm288_vm2, %v273_v57 }
  0x39   : > { %1481 = vmatprep.mubr.msk.bf16.mxu1 %vm1764_vm1, %v1763_v2 }
  0x3d   : > { %1544 = vmatmul.mubr.msk.bf16.vlgmr.msra.gmra.mrb[0].mxu0 %vm288_vm2, %v773_v61 }
  0x3e   : > { %1556 = vmatpush3.bf16.msra.mxu0 %v873_v63  ;;  %1547 = vmatprep.mubr.msk.bf16.mxu0 %vm1764_vm1, %v1763_v2 }
  0x3f   : > { %1569 = vmatprep.subr.bf16.mxu0 %v1763_v2 }
  0x40   : > { %1482 = vmatmul.mubr.msk.bf16.gmra.mrb[8].mxu1 %vm288_vm2, %v274_v0 }
  0x41   : > { %1487 = vmatprep.mubr.msk.bf16.mxu1 %vm1764_vm1, %v1763_v2 }
  0x45   : > { %1548 = vmatmul.mubr.msk.bf16.gmra.mrb[4].mxu0 %vm288_vm2, %v774_v1 }
  0x46   : > { %1551 = vmatprep.mubr.msk.bf16.mxu0 %vm1764_vm1, %v1763_v2 }
  0x48   : > { %1488 = vmatmul.mubr.msk.bf16.vlgmr.msra.gmra.mrb[0].mxu1 %vm288_vm2, %v433_v7 }
  0x49   : > { %1500 = vmatpush3.bf16.msra.mxu1 %v533_v8  ;;  %1491 = vmatprep.mubr.msk.bf16.mxu1 %vm1764_vm1, %v1763_v2 }
  0x4a   : > { %1583 = vmatprep.subr.bf16.mxu1 %v1763_v2 }
  0x4d   : > { %1552 = vmatmul.mubr.msk.bf16.gmra.mrb[8].mxu0 %vm288_vm2, %v775_v10 }
  0x4e   : > { %1557 = vmatprep.mubr.msk.bf16.mxu0 %vm1764_vm1, %v1763_v2 }
  0x50   : > { %1492 = vmatmul.mubr.msk.bf16.gmra.mrb[4].mxu1 %vm288_vm2, %v434_v13 }
  0x51   : > { %1495 = vmatprep.mubr.msk.bf16.mxu1 %vm1764_vm1, %v1763_v2 }
  0x55   : > { %1558 = vmatmul.mubr.msk.bf16.vlgmr.msra.gmra.mrb[0].mxu0 %vm288_vm2, %v858_v17 }
  0x56   : > { %1570 = vmatpush3.bf16.msra.mxu0 %v958_v19  ;;  %1561 = vmatprep.mubr.msk.bf16.mxu0 %vm1764_vm1, %v1763_v2 }
  0x58   : > { %1496 = vmatmul.mubr.msk.bf16.gmra.mrb[8].mxu1 %vm288_vm2, %v435_v20 }
  0x59   : > { %1501 = vmatprep.mubr.msk.bf16.mxu1 %vm1764_vm1, %v1763_v2 }
  0x5d   : > { %1562 = vmatmul.mubr.msk.bf16.gmra.mrb[4].mxu0 %vm288_vm2, %v859_v23 }
  0x5e   : > { %1565 = vmatprep.mubr.msk.bf16.mxu0 %vm1764_vm1, %v1763_v2 }
  0x60   : > { %1502 = vmatmul.mubr.msk.bf16.vlgmr.msra.gmra.mrb[0].mxu1 %vm288_vm2, %v518_v24 }
  0x61   : > { %1584 = vmatpush3.bf16.msra.mxu1 %v1833_v4  ;;  %1505 = vmatprep.mubr.msk.bf16.mxu1 %vm1764_vm1, %v1763_v2  ;;  %v1359_v4 = vld [vmem:[%s1853_s8 + $0x2a] sm:$0xff] }
  0x62   : > { %v520_v31 = vpack.c.bf16 %v1359_v4, %v1359_v4 }
  0x65   : > { %1566 = vmatmul.mubr.msk.bf16.gmra.mrb[8].mxu0 %vm288_vm2, %v860_v26 }
  0x66   : > { %1571 = vmatprep.mubr.msk.bf16.mxu0 %vm1764_vm1, %v1763_v2 }
  0x68   : > { %1506 = vmatmul.mubr.msk.bf16.gmra.mrb[4].mxu1 %vm288_vm2, %v519_v27 }
  0x69   : > { %1509 = vmatprep.mubr.msk.bf16.mxu1 %vm1764_vm1, %v1763_v2 }
  0x6d   : > { %1572 = vmatmul.mubr.msk.bf16.vlgmr.msra.gmra.mrb[0].mxu0 %vm288_vm2, %v943_v30 }
  0x6e   : > { %1575 = vmatprep.mubr.msk.bf16.mxu0 %vm1764_vm1, %v1763_v2 }
  0x70   : > { %1510 = vmatmul.mubr.msk.bf16.gmra.mrb[8].mxu1 %vm288_vm2, %v520_v31 }
  0x71   : > { %1519 = vmatprep.mubr.msk.bf16.mxu1 %vm1764_vm1, %v1763_v2 }
  0x75   : > { %1576 = vmatmul.mubr.msk.bf16.gmra.mrb[4].mxu0 %vm288_vm2, %v944_v34 }
  0x76   : > { %1579 = vmatprep.mubr.msk.bf16.mxu0 %vm1764_vm1, %v1763_v2 }
  0x78   : > { %1520 = vmatmul.mubr.msk.bf16.vlgmr.msra.gmra.mrb[4].mxu1 %vm288_vm2, %v604_v37 }
  0x79   : > { %1523 = vmatprep.mubr.msk.bf16.mxu1 %vm1764_vm1, %v1763_v2 }
  0x7d   : > { %1580 = vmatmul.mubr.msk.bf16.gmra.mrb[8].mxu0 %vm288_vm2, %v945_v39 }
  0x80   : > { %1524 = vmatmul.mubr.msk.bf16.gmra.mrb[8].mxu1 %vm288_vm2, %v605_v41 }
  0x93   : > { %v2018_v46 = vpop.permute.xlu0 %1072  ;;  %v1083_v61 = vpop.permute.xlu1 %1082 }
  0x97   : > { %v2027_v50 = vpop.permute.xlu0 %1077 }
  0x9b   : > { %v1088_v11 = vpop.permute.xlu1 %1087 }
  0x9c   : > { %v1093_v25 = vpop.permute.xlu0 %1092 }
  0xaa   : > { %v1118_v4 = vpop.permute.xlu1 %1117 }
  0xab   : > { %1721 = vrcp.f32 %v1118_v4 }
  0xb5   : > { %v1722_v38 = vpop.eup %1721 }
 0x133   : > { %v569_v42 = vpop.f32.mrb[0].mxu1 }
 0x134   : > { %v1503_v43 = vpop.f32.mrb[1].mxu1 }
 0x135   : > { %v572_v44 = vpop.f32.mrb[2].mxu1 }
 0x136   : > { %v1504_v45 = vpop.f32.mrb[3].mxu1 }
 0x140   : > { %v994_v47 = vpop.f32.mrb[0].mxu0 }
 0x141   : > { %v2020_v48 = vadd.f32 %v994_v47, %v569_v42  ;;  %v1573_v49 = vpop.f32.mrb[1].mxu0 }
 0x142   : > { %v997_v2 = vpop.f32.mrb[2].mxu0 }
 0x143   : > { %v1416_v51 = vpack.c.bf16 %v2020_v48, %v2020_v48  ;;  %v1095_v52 = vmul.f32 %v2020_v48, %v2018_v46  ;;  %v2033_v53 = vadd.f32 %v997_v2, %v572_v44  ;;  %v1574_v54 = vpop.f32.mrb[3].mxu0 }
 0x145   : > { %1043 = vst.msk [vmem:[%s2025_s12] sm:$0xf] %vm1042_vm4, %v1416_v51  ;;  %v1417_v55 = vpack.c.bf16 %v2033_v53, %v2033_v53  ;;  %v1096_v56 = vmul.f32 %v2033_v53, %v2027_v50  ;;  %v1100_v57 = vsel %vm288_vm2, %v1095_v52, 0.0 }
 0x147   : > { %1044 = vst.msk [vmem:[%s2025_s12 + $0x4] sm:$0xf] %vm1042_vm4, %v1417_v55  ;;  %v1101_v58 = vsel %vm288_vm2, %v1096_v56, 0.0 }
 0x148   : > { %v1102_v59 = vadd.f32 %v1101_v58, %v1100_v57  ;;  %v1002_v60 = vpop.f32.mrb[4].mxu0 }
 0x149   : > { %v1577_v62 = vpop.f32.mrb[5].mxu0 }
 0x14a   : > { %v1005_v63 = vpop.f32.mrb[6].mxu0 }
 0x14b   : > { %v1578_v0 = vpop.f32.mrb[7].mxu0  ;;  %v662_v1 = vpop.f32.mrb[4].mxu1 }
 0x14c   : > { %v1587_v3 = vadd.f32 %v1002_v60, %v662_v1  ;;  %v1521_v5 = vpop.f32.mrb[5].mxu1 }
 0x14d   : > { %v665_v6 = vpop.f32.mrb[6].mxu1 }
 0x14e   : > { %v1418_v7 = vpack.c.bf16 %v1587_v3, %v1587_v3  ;;  %v1097_v8 = vmul.f32 %v1587_v3, %v1083_v61  ;;  %v1588_v9 = vadd.f32 %v1005_v63, %v665_v6  ;;  %v1522_v10 = vpop.f32.mrb[7].mxu1 }
 0x150   : > { %1045 = vst.msk [vmem:[%s2025_s12 + $0x8] sm:$0xf] %vm1042_vm4, %v1418_v7  ;;  %v1103_v12 = vsel %vm288_vm2, %v1097_v8, 0.0  ;;  %v1419_v13 = vpack.c.bf16 %v1588_v9, %v1588_v9  ;;  %v1098_v14 = vmul.f32 %v1588_v9, %v1088_v11  ;;  %v1010_v15 = vpop.f32.mrb[8].mxu0 }
 0x151   : > { %v1104_v16 = vadd.f32 %v1103_v12, %v1102_v59  ;;  %v1581_v17 = vpop.f32.mrb[9].mxu0 }
 0x152   : > { %1046 = vst.msk [vmem:[%s2025_s12 + $0xc] sm:$0xf] %vm1042_vm4, %v1419_v13  ;;  %v1105_v18 = vsel %vm288_vm2, %v1098_v14, 0.0  ;;  %v1013_v19 = vpop.f32.mrb[10].mxu0 }
 0x153   : > { %v1106_v20 = vadd.f32 %v1105_v18, %v1104_v16  ;;  %v1582_v21 = vpop.f32.mrb[11].mxu0  ;;  %v670_v22 = vpop.f32.mrb[8].mxu1 }
 0x154   : > { %v1589_v23 = vadd.f32 %v1010_v15, %v670_v22  ;;  %v1525_v24 = vpop.f32.mrb[9].mxu1 }
 0x155   : > { %v673_v26 = vpop.f32.mrb[10].mxu1 }
 0x156   : > { %v1420_v27 = vpack.c.bf16 %v1589_v23, %v1589_v23  ;;  %v1099_v28 = vmul.f32 %v1589_v23, %v1093_v25  ;;  %v1526_v29 = vpop.f32.mrb[11].mxu1 }
 0x158   : > { %1047 = vst.msk [vmem:[%s2025_s12 + $0x10] sm:$0xf] %vm1042_vm4, %v1420_v27  ;;  %v1107_v30 = vsel %vm288_vm2, %v1099_v28, 0.0 }
 0x159   : > { %v1108_v31 = vadd.f32 %v1107_v30, %v1106_v20 }
 0x15b   : > { %v1109_v32 = vrot.slane %v1108_v31, 4 }
 0x15d   : > { %v1110_v33 = vadd.f32 %v1109_v32, %v1108_v31 }
 0x15f   : > { %v1111_v34 = vrot.slane %v1110_v33, 2 }
 0x161   : > { %v1112_v35 = vadd.f32 %v1111_v34, %v1110_v33 }
 0x163   : > { %v1113_v36 = vrot.slane %v1112_v35, 1 }
 0x165   : > { %v1114_v37 = vadd.f32 %v1113_v36, %v1112_v35 }
 0x167   : > { %v1121_v39 = vmul.f32 %v1722_v38, %v1114_v37  ;;  %1133 = vst.msk [vmem:[%s2060_s24] sm:$0x1] %vm1132_vm5, %v1114_v37 }
 0x169   : > { %v1122_v40 = vsub.f32 %v2020_v48, %v1121_v39  ;;  %v1123_v41 = vsub.f32 %v2033_v53, %v1121_v39  ;;  %v1124_v42 = vsub.f32 %v1587_v3, %v1121_v39  ;;  %v1125_v43 = vsub.f32 %v1588_v9, %v1121_v39 }
 0x16a   : > { %v1126_v44 = vsub.f32 %v1589_v23, %v1121_v39 }
 0x16b   : > { %v1127_v45 = vmul.f32 %v1122_v40, %v2018_v46  ;;  %v1128_v47 = vmul.f32 %v1123_v41, %v2027_v50  ;;  %v1129_v49 = vmul.f32 %v1124_v42, %v1083_v61  ;;  %v1130_v2 = vmul.f32 %v1125_v43, %v1088_v11 }
 0x16c   : > { %v1131_v51 = vmul.f32 %v1126_v44, %v1093_v25 }
 0x16d   : > { %v1134_v52 = vmul.f32 %v1127_v45, %v1127_v45  ;;  %v1135_v54 = vmul.f32 %v1128_v47, %v1128_v47  ;;  %v1136_v55 = vmul.f32 %v1129_v49, %v1129_v49  ;;  %v1137_v56 = vmul.f32 %v1130_v2, %v1130_v2 }
 0x16e   : > { %v1138_v58 = vmul.f32 %v1131_v51, %v1131_v51 }
 0x16f   : > { %v1139_v57 = vsel %vm288_vm2, %v1134_v52, 0.0  ;;  %v1140_v48 = vsel %vm288_vm2, %v1135_v54, 0.0  ;;  %v1142_v59 = vsel %vm288_vm2, %v1136_v55, 0.0  ;;  %v1144_v46 = vsel %vm288_vm2, %v1137_v56, 0.0 }
 0x170   : > { %v1141_v53 = vadd.f32 %v1140_v48, %v1139_v57  ;;  %v1146_v61 = vsel %vm288_vm2, %v1138_v58, 0.0 }
 0x172   : > { %v1143_v60 = vadd.f32 %v1142_v59, %v1141_v53 }
 0x174   : > { %v1145_v50 = vadd.f32 %v1144_v46, %v1143_v60 }
 0x176   : > { %v1147_v62 = vadd.f32 %v1146_v61, %v1145_v50 }
 0x178   : > { %v1148_v63 = vrot.slane %v1147_v62, 4 }
 0x17a   : > { %v1149_v0 = vadd.f32 %v1148_v63, %v1147_v62 }
 0x17c   : > { %v1150_v1 = vrot.slane %v1149_v0, 2 }
 0x17e   : > { %v1151_v3 = vadd.f32 %v1150_v1, %v1149_v0 }
 0x180   : > { %v1152_v5 = vrot.slane %v1151_v3, 1 }
 0x182   : > { %v1153_v6 = vadd.f32 %v1152_v5, %v1151_v3 }
 0x184   : > { %1154 = vst.msk [vmem:[%s2060_s24 + $0x1] sm:$0x1] %vm1132_vm5, %v1153_v6 }
 0x185 PF: > { %s15_s19 = sadd.s32 1, %s1761_s19   ;;  %s2095_s15 = smov %s1753_s17 }
 0x186   : > { %p12_p8 = scmp.ge.s32.totalorder %s15_s19, 6   ;;  %s2096_s16 = smov %s1757_s18 }
 0x187   : > { %s2097_s17 = smov %s2100_s20  ;;  %s2098_s18 = smov %s2104_s21 }
 0x188   :  { %14 = sbr.rel (!%p12_p8) target bundleno = 3 (0x3), region = 94 }

// kernel: encoder_block.13
= control target key start
LH: loop header
LB: loop body
LE: loop exit
PB: predicated region body
PF: predicated region fallthrough
CT: control target
= control target key end

     0   :  { %s497_s12 = smov 0   ;;  %s499_s13 = smov 0   ;;  %s554_s0 = inlined_call_operand.vmem [shape: bf16[2,80,8], index: 0, kind: input, shape index: {}, may-alias: {0,3}]   ;;  %s555_s1 = inlined_call_operand.vmem [shape: f32[1,8], index: 1, kind: input, shape index: {}]   ;;  %s556_s2 = inlined_call_operand.vmem [shape: f32[1,8], index: 2, kind: input, shape index: {}]   ;;  %s557_s3 = inlined_call_operand.vmem [shape: bf16[2,80,8], index: 3, kind: output, shape index: {}, may-alias: {0,3}]  }
   0x1   :  { %s501_s14 = smov 0   ;;  %s503_s15 = smov 0  }
   0x2   :  { %s505_s16 = smov 0  }
   0x3 LB: > { %s22_s17 = sadd.s32 1, %s467_s14  ;;  %s25_s18 = sadd.s32 1, %s471_s15  ;;  %s475_s16 = sphi %s505_s16, %s13_s16   ;;  %s471_s15 = sphi %s503_s15, %s561_s15   ;;  %s467_s14 = sphi %s501_s14, %s560_s14   ;;  %s463_s13 = sphi %s499_s13, %s559_s13   ;;  %s459_s12 = sphi %s497_s12, %s558_s12  }
   0x4   : > { %p23_p0 = scmp.ge.s32.totalorder %s22_s17, 2  ;;  %p370_p1 = scmp.ge.s32.totalorder %s475_s16, 1 }
   0x5   : > { %p158_p2 = scmp.lt.s32.totalorder %s475_s16, 5 }
   0x6   : > { %s563_s17 = smov (%p23_p0, %s22_s17), 0  ;;  %s565_s18 = smov (!%p23_p0, %s25_s18), %s471_s15 }
   0x7   : > { %p159_p3 = pnand %p370_p1, %p158_p2  ;;  %p27_p4 = scmp.ge.s32.totalorder %s565_s18, 2 }
   0x8   : > { %s190_s19 = smul.u32 (!%p159_p3), 5, %s459_s12  ;;  %p191_p5 = scmp.lt.s32.totalorder (!%p159_p3), %s463_s13, 1  ;;  %v373_v0 = vld [vmem:[%s555_s1] ss:$0 sm:$0xff] (!%p159_p3)  ;;  %vm270_vm0 = vcmask (!%p159_p3), 60416  }
   0x9   : > { %s567_s18 = smov (%p27_p4, %s565_s18), 0  ;;  %162 = sbr.rel (%p159_p3) target bundleno = 36 (0x24), region = 32 }
   0xa   : > { %p193_p6 = scmp.lt.s32.totalorder (!%p159_p3), %s190_s19, 9  ;;  %v374_v8 = vld [vmem:[%s556_s2] ss:$0 sm:$0xff] (!%p159_p3) }
  0x10   : > { %s569_s13 = smov (!%p191_p5, %s463_s13), 1  ;;  %s571_s19 = smov (!%p193_p6, %s190_s19), 9 }
  0x11   : > { %s396_s20 = smul.u32 10, %s569_s13 }
  0x13   : > { %s196_s21 = sadd.s32 %s396_s20, %s571_s19 }
  0x14   : > { %s371_s22 = sshll.u32 %s196_s21, 2 }
  0x15   : > { %s198_s25 = scalar_lea.vmem %s554_s0, %s371_s22  ;;  %s208_s5 = scalar_lea.vmem %s557_s3, %s371_s22 }
  0x16   : > { %v388_v1 = vld [vmem:[%s198_s25] sm:$0xff]   ;;  %v395_v2 = vld [vmem:[%s198_s25 + $0x8] sm:$0xff]   ;;  %v214_v3 = vld [vmem:[%s198_s25 + $0x10] sm:$0xf] }
  0x17   : > { %v389_v4 = vunpack.c.l.bf16 %v388_v1  ;;  %v219_v5 = vunpack.c.l.bf16 %v214_v3  ;;  %v390_v6 = vunpack.c.h.bf16 %v388_v1  ;;  %v393_v7 = vunpack.c.l.bf16 %v395_v2 }
  0x18   : > { %v394_v9 = vunpack.c.h.bf16 %v395_v2 }
  0x19   : > { %v227_v10 = vmul.f32 %v389_v4, %v373_v0  ;;  %v231_v11 = vmul.f32 %v373_v0, %v219_v5  ;;  %v228_v12 = vmul.f32 %v390_v6, %v373_v0  ;;  %v229_v13 = vmul.f32 %v393_v7, %v373_v0 }
  0x1a   : > { %v230_v14 = vmul.f32 %v394_v9, %v373_v0 }
  0x1b   : > { %v239_v15 = vadd.f32 %v374_v8, %v227_v10  ;;  %v240_v16 = vadd.f32 %v374_v8, %v228_v12  ;;  %v241_v17 = vadd.f32 %v374_v8, %v229_v13  ;;  %v243_v18 = vadd.f32 %v374_v8, %v231_v11 }
  0x1c   : > { %v242_v19 = vadd.f32 %v374_v8, %v230_v14 }
  0x1d   : > { %v244_v20 = vmax.f32 %v239_v15, 0.0  ;;  %v245_v21 = vmax.f32 %v240_v16, 0.0  ;;  %v246_v22 = vmax.f32 %v241_v17, 0.0  ;;  %v248_v23 = vmax.f32 %v243_v18, 0.0 }
  0x1e   : > { %v247_v24 = vmax.f32 %v242_v19, 0.0 }
  0x1f   : > { %v382_v25 = vpack.c.bf16 %v244_v20, %v244_v20  ;;  %v383_v26 = vpack.c.bf16 %v245_v21, %v245_v21  ;;  %v384_v27 = vpack.c.bf16 %v246_v22, %v246_v22  ;;  %v386_v28 = vpack.c.bf16 %v248_v23, %v248_v23 }
  0x20   : > { %v385_v29 = vpack.c.bf16 %v247_v24, %v247_v24 }
  0x21   : > { %271 = vst.msk [vmem:[%s208_s5] sm:$0xf] %vm270_vm0, %v382_v25  ;;  %272 = vst.msk [vmem:[%s208_s5 + $0x4] sm:$0xf] %vm270_vm0, %v383_v26 }
  0x22   : > { %273 = vst.msk [vmem:[%s208_s5 + $0x8] sm:$0xf] %vm270_vm0, %v384_v27  ;;  %275 = vst.msk [vmem:[%s208_s5 + $0x10] sm:$0xf] %vm270_vm0, %v386_v28 }
  0x23   : > { %274 = vst.msk [vmem:[%s208_s5 + $0xc] sm:$0xf] %vm270_vm0, %v385_v29 }
  0x24 PF: > { %s13_s16 = sadd.s32 1, %s475_s16   ;;  %s558_s12 = smov %s467_s14 }
  0x25   : > { %p10_p7 = scmp.ge.s32.totalorder %s13_s16, 6   ;;  %s559_s13 = smov %s471_s15 }
  0x26   : > { %s560_s14 = smov %s563_s17  ;;  %s561_s15 = smov %s567_s18 }
  0x27   :  { %12 = sbr.rel (!%p10_p7) target bundleno = 3 (0x3), region = 62 }

</bundles_post_ra>
